<compile_context>
chip_gen: v5e
topology: v5e:2x2
jax: 0.10.0
libtpu: 0.0.40
codegen_flags: <defaults>
</compile_context>

<pallas_src>
import jax
import jax.numpy as jnp
import numpy as np
from jax.experimental import pallas as pl
from jax.experimental.pallas import tpu as pltpu


def ssl_projection_kernel(frames_ref, wssl_ref, bssl_ref, x_ref, psum_ref):
    """One row-tile of the synthetic SSL projection + fused partial time-sum.

    frames_ref : (TM, F)    f32   framed waveform rows (this tile)
    wssl_ref   : (F, D)     bf16  projection weight (resident across grid steps)
    bssl_ref   : (1, D)     f32   projection bias   (resident across grid steps)
    x_ref      : (TM, D)          output frame features for this tile
    psum_ref   : (1, 8, D)  f32   sublane-grouped column sums of this tile's x
    """
    frames = frames_ref[...].astype(jnp.bfloat16)            # in-kernel cast (VPU filler)
    acc = jnp.dot(frames, wssl_ref[...],
                  preferred_element_type=jnp.float32)        # MXU, f32 accumulate
    xb = acc + bssl_ref[...]                                 # (TM, D) f32
    x_ref[...] = xb.astype(x_ref.dtype)                      # lane-dense store

    # Fused partial reduction for x.mean(dim=1): sum rows in sublane-aligned
    # groups of 8 (pure VPU adds, no cross-sublane reduce). Wrapper finishes
    # the reduction across tiles and sublanes and divides by T.
    tm, d = xb.shape
    psum_ref[...] = jnp.sum(xb.reshape(tm // 8, 8, d), axis=0)[None]


def _choose_tile_m(T, desired):
    """Largest divisor of T that is a multiple of 8 and <= desired."""
    best = None
    for cand in range(8, min(T, desired) + 1, 8):
        if T % cand == 0:
            best = cand
    assert best is not None, "T must have a divisor that is a multiple of 8"
    return best


def mos_predictor_forward(wav, w_ssl, b_ssl, w_out, b_out, *,
                          frame_len, tile_m=1024, x_dtype=jnp.float32):
    """Mirrors MosPredictor.forward: returns (x, out), x (B,T,D), out (B,) f32."""
    # wav: (B, 1, T_wav)  ->  squeeze(1)  ->  (B, T_wav)
    wav = jnp.squeeze(wav, axis=1)
    B, T_wav = wav.shape
    F = frame_len
    assert T_wav % F == 0, "waveform length must be a multiple of frame_len"
    T = T_wav // F
    D = w_ssl.shape[1]
    N = B * T

    # tile_m divides T -> tiles never cross batch boundaries, no padding, no
    # tail slice, and the fused partial sums are never polluted by pad rows.
    tm = _choose_tile_m(T, tile_m)
    n_blocks = N // tm
    tiles_per_batch = T // tm

    # Frame + flatten in the wrapper (free XLA metadata). Frames stay f32 here;
    # the bf16 cast happens inside the kernel (no extra HBM copy).
    frames2d = wav.reshape(N, F)                              # (B*T, F) f32

    w_ssl_bf16 = w_ssl.astype(jnp.bfloat16)                   # (F, D), tiny, resident
    b_ssl_2d = b_ssl.reshape(1, D).astype(jnp.float32)        # (1, D)

    x_bytes = jnp.dtype(x_dtype).itemsize
    cost = pl.CostEstimate(
        flops=2 * N * F * D + 2 * N * D,
        transcendentals=0,
        bytes_accessed=(4 * N * F            # f32 frames in
                        + 2 * F * D + 4 * D  # weight (bf16) + bias (f32)
                        + x_bytes * N * D    # x out
                        + 4 * n_blocks * 8 * D),  # partial sums out
    )

    x2d, psums = pl.pallas_call(
        ssl_projection_kernel,
        grid=(n_blocks,),
        in_specs=[
            pl.BlockSpec((tm, F), lambda i: (i, 0)),          # frames: row tiles
            pl.BlockSpec((F, D), lambda i: (0, 0)),           # weight: resident
            pl.BlockSpec((1, D), lambda i: (0, 0)),           # bias:   resident
        ],
        out_specs=(
            pl.BlockSpec((tm, D), lambda i: (i, 0)),          # x: row tiles
            pl.BlockSpec((1, 8, D), lambda i: (i, 0, 0)),     # per-tile partial sums
        ),
        out_shape=(
            jax.ShapeDtypeStruct((N, D), x_dtype),
            jax.ShapeDtypeStruct((n_blocks, 8, D), jnp.float32),
        ),
        compiler_params=pltpu.CompilerParams(
            dimension_semantics=("parallel",)),               # 2 TCs on v7x
        cost_estimate=cost,
    )(frames2d, w_ssl_bf16, b_ssl_2d)

    x = x2d.reshape(B, T, D)                                  # res['x'] equivalent

    # Finish x.mean(dim=1) from the fused f32 partial sums (no re-read of x),
    # then the Linear(D, 1) head: O(B*D) work, plain JAX.
    mean_feats = psums.reshape(B, tiles_per_batch * 8, D).sum(axis=1) / T   # (B, D) f32
    out = mean_feats @ w_out.astype(jnp.float32) + b_out.astype(jnp.float32)
    return x, jnp.squeeze(out, axis=-1)                       # (B, T, D), (B,)


if __name__ == "__main__":
    # Deterministic small setup with TPU-friendly dims:
    #   B=2, 65536-sample waveform (~4s @ 16 kHz), frame_len F=128 -> T=512 frames,
    #   ssl_out_dim D=256 (lane-dense, multiple of 128). Rows = B*T = 1024,
    #   tile_m resolves to 512 (largest divisor of T) -> 2-step grid, ~1.6 MiB VMEM.
    B, T_wav, frame_len, D = 2, 65536, 128, 256
    F = frame_len

    key = jax.random.PRNGKey(0)
    k_wav, k_wssl, k_bssl, k_wout, k_bout = jax.random.split(key, 5)

    wav = jax.random.normal(k_wav, (B, 1, T_wav), dtype=jnp.float32)

    # Synthetic SSL projection weights (deterministic), uniform like nn.Linear.
    lim_ssl = 1.0 / np.sqrt(F)
    w_ssl = jax.random.uniform(k_wssl, (F, D), minval=-lim_ssl, maxval=lim_ssl,
                               dtype=jnp.float32)
    b_ssl = jax.random.uniform(k_bssl, (D,), minval=-lim_ssl, maxval=lim_ssl,
                               dtype=jnp.float32)

    # output_layer = nn.Linear(ssl_features, 1)
    lim_out = 1.0 / np.sqrt(D)
    w_out = jax.random.uniform(k_wout, (D, 1), minval=-lim_out, maxval=lim_out,
                               dtype=jnp.float32)
    b_out = jax.random.uniform(k_bout, (1,), minval=-lim_out, maxval=lim_out,
                               dtype=jnp.float32)

    x, out = mos_predictor_forward(wav, w_ssl, b_ssl, w_out, b_out,
                                   frame_len=frame_len, tile_m=1024)
    jax.block_until_ready((x, out))

    # Pure-JAX f32 reference (kernel uses bf16 matmul inputs -> loosened tolerance).
    frames_ref = jnp.squeeze(wav, axis=1).reshape(B, T_wav // F, F)
    x_ref = frames_ref @ w_ssl + b_ssl[None, None, :]
    out_ref = (x_ref.mean(axis=1) @ w_out + b_out[None, :]).squeeze(1)

    assert x.shape == (B, T_wav // F, D) and out.shape == (B,)
    np.testing.assert_allclose(np.asarray(x), np.asarray(x_ref),
                               rtol=1e-2, atol=1e-2)
    np.testing.assert_allclose(np.asarray(out), np.asarray(out_ref),
                               rtol=1e-2, atol=1e-2)

    # TODO(synk): the real ssl_model (wav2vec2-style transformer) is an injected
    # external dependency and is stood in by a single framed linear projection.
    print("KERNEL_OK")
</pallas_src>

<mosaic_0001>
module attributes {stable_mosaic.version = 11 : i64} {
  func.func @ssl_projection_kernel(%arg0: i32, %arg1: memref<512x128xf32, #tpu.memory_space<vmem>>, %arg2: memref<128x256xbf16, #tpu.memory_space<vmem>>, %arg3: memref<1x256xf32, #tpu.memory_space<vmem>>, %arg4: memref<512x256xf32, #tpu.memory_space<vmem>>, %arg5: memref<1x8x256xf32, #tpu.memory_space<vmem>>) attributes {dimension_semantics = [#tpu.dimension_semantics<parallel>], iteration_bounds = array<i64: 2>, scalar_prefetch = 0 : i64, scratch_operands = 0 : i64, tpu.core_type = #tpu.core_type<tc>, window_params = [{transform_indices = @transform_0, window_bounds = array<i64: 512, 128>}, {pipeline_mode = #tpu.pipeline_mode<synchronous>, transform_indices = @transform_1, window_bounds = array<i64: 128, 256>}, {pipeline_mode = #tpu.pipeline_mode<synchronous>, transform_indices = @transform_2, window_bounds = array<i64: 1, 256>}, {transform_indices = @transform_3, window_bounds = array<i64: 512, 256>}, {transform_indices = @transform_4, window_bounds = array<i64: 1, 8, 256>}]} {
    %c0 = arith.constant 0 : index
    %c0_0 = arith.constant 0 : index
    %0 = vector.load %arg1[%c0, %c0_0] : memref<512x128xf32, #tpu.memory_space<vmem>>, vector<512x128xf32>
    %1 = arith.truncf %0 : vector<512x128xf32> to vector<512x128xbf16>
    %c0_1 = arith.constant 0 : index
    %c0_2 = arith.constant 0 : index
    %2 = vector.load %arg2[%c0_1, %c0_2] : memref<128x256xbf16, #tpu.memory_space<vmem>>, vector<128x256xbf16>
    %cst = arith.constant dense<0.000000e+00> : vector<512x256xf32>
    %3 = tpu.matmul %1, %2, %cst {dimension_numbers = #tpu.dot_dimension_numbers<[1], [0], [0], [1], [0, 0, 1, 1], [], []>} : vector<512x128xbf16>, vector<128x256xbf16>, vector<512x256xf32> -> vector<512x256xf32>
    %c0_3 = arith.constant 0 : index
    %c0_4 = arith.constant 0 : index
    %4 = vector.load %arg3[%c0_3, %c0_4] : memref<1x256xf32, #tpu.memory_space<vmem>>, vector<1x256xf32>
    %5 = vector.broadcast %4 : vector<1x256xf32> to vector<512x256xf32>
    %6 = arith.addf %3, %5 : vector<512x256xf32>
    %c0_5 = arith.constant 0 : index
    %c0_6 = arith.constant 0 : index
    %7 = vector.load %arg4[%c0_5, %c0_6] : memref<512x256xf32, #tpu.memory_space<vmem>>, vector<512x256xf32>
    tpu.vector_store %arg4[%c0_5, %c0_6], %6 {strides = array<i32>} : memref<512x256xf32, #tpu.memory_space<vmem>>, vector<512x256xf32>,
    %8 = vector.shape_cast %6 : vector<512x256xf32> to vector<64x8x256xf32>
    %cst_7 = arith.constant dense<0.000000e+00> : vector<8x256xf32>
    %9 = vector.multi_reduction <add>, %8, %cst_7 [0] : vector<64x8x256xf32> to vector<8x256xf32>
    %10 = vector.shape_cast %9 : vector<8x256xf32> to vector<1x8x256xf32>
    %c0_8 = arith.constant 0 : index
    %c0_9 = arith.constant 0 : index
    %c0_10 = arith.constant 0 : index
    %11 = vector.load %arg5[%c0_8, %c0_9, %c0_10] : memref<1x8x256xf32, #tpu.memory_space<vmem>>, vector<1x8x256xf32>
    tpu.vector_store %arg5[%c0_8, %c0_9, %c0_10], %10 {strides = array<i32>} : memref<1x8x256xf32, #tpu.memory_space<vmem>>, vector<1x8x256xf32>,
    return
  }
  func.func @transform_0(%arg0: i32) -> (i32, i32) {
    %c0_i32 = arith.constant 0 : i32
    %c0_i32_0 = arith.constant 0 : i32
    return %arg0, %c0_i32 : i32, i32
  }
  func.func @transform_1(%arg0: i32) -> (i32, i32) {
    %c0_i32 = arith.constant 0 : i32
    %c0_i32_0 = arith.constant 0 : i32
    %c0_i32_1 = arith.constant 0 : i32
    return %c0_i32, %c0_i32_0 : i32, i32
  }
  func.func @transform_2(%arg0: i32) -> (i32, i32) {
    %c0_i32 = arith.constant 0 : i32
    %c0_i32_0 = arith.constant 0 : i32
    %c0_i32_1 = arith.constant 0 : i32
    return %c0_i32, %c0_i32_0 : i32, i32
  }
  func.func @transform_3(%arg0: i32) -> (i32, i32) {
    %c0_i32 = arith.constant 0 : i32
    %c0_i32_0 = arith.constant 0 : i32
    return %arg0, %c0_i32 : i32, i32
  }
  func.func @transform_4(%arg0: i32) -> (i32, i32, i32) {
    %c0_i32 = arith.constant 0 : i32
    %c0_i32_0 = arith.constant 0 : i32
    %c0_i32_1 = arith.constant 0 : i32
    return %arg0, %c0_i32, %c0_i32_0 : i32, i32, i32
  }
}

</mosaic_0001>

<bundles_post_ra>
// kernel: tpu_custom_call.1
= control target key start
LH: loop header
LB: loop body
LE: loop exit
PB: predicated region body
PF: predicated region fallthrough
CT: control target
= control target key end

     0   :  { %10 = vsyncpa [#allocation3], 0  ;;  %s2431_s0 = inlined_call_operand.hbm [shape: f32[1024,128], index: 0, kind: input, shape index: {}]   ;;  %s2432_s1 = inlined_call_operand.hbm [shape: bf16[128,256], index: 1, kind: input, shape index: {}]   ;;  %s2433_s2 = inlined_call_operand.hbm [shape: f32[1,256], index: 2, kind: input, shape index: {}]   ;;  %s2434_s3 = inlined_call_operand.hbm [shape: f32[1024,256], index: 3, kind: output, shape index: {0}]   ;;  %s2435_s4 = inlined_call_operand.hbm [shape: f32[2,8,256], index: 4, kind: output, shape index: {1}]  }
   0x1   :  { %12 = vsyncpa [#allocation3 + $0x1], 0 }
   0x2   :  { %13 = vsyncpa [#allocation6], 0 }
   0x3   :  { %14 = vsyncpa [#allocation4], 0 }
   0x4   :  { %16 = vsyncpa [#allocation4 + $0x1], 0 }
   0x5   :  { %17 = vsyncpa [#allocation10], 0 }
   0x6   :  { %19 = vsyncpa [#allocation10 + $0x1], 0  ;;  %s1640_s15 = smov 0   ;;  %s1642_s16 = smov 0  }
   0x7   :  { %s1644_s17 = smov 0   ;;  %s1646_s18 = smov 0  }
   0x8 LB: > { %s1661_s19 = sadd.s32 4294967295, %s1607_s18   ;;  %s1216_s20 = sadd.s32 4294967294, %s1607_s18   ;;  %s1607_s18 = sphi %s1646_s18, %s2499_s18   ;;  %s1603_s17 = sphi %s1644_s17, %s2498_s17   ;;  %s1599_s16 = sphi %s1642_s16, %s2497_s16   ;;  %s1595_s15 = sphi %s1640_s15, %s2496_s15  }
   0x9   : > { %p45_p0 = scmp.ne.s32.totalorder %s1599_s16, %s1595_s15  ;;  %p46_p1 = scmp.eq.s32.totalorder %s1661_s19, 0 }
   0xa   : > { %p111_p2 = scmp.eq.s32.totalorder %s1661_s19, 1  ;;  %p117_p3 = scmp.eq.s32.totalorder %s1216_s20, 1 }
   0xb   : > { %p1670_p4 = por %p46_p1, %p45_p0  ;;  %p1217_p5 = scmp.ge.s32.totalorder %s1607_s18, 1 }
   0xc   : > { %p1675_p6 = por %p117_p3, %p45_p0  ;;  %p150_p7 = scmp.lt.s32.totalorder %s1607_s18, 3 }
   0xd   : > { %s161_s25 = sshll.u32 %s2432_s1, 4  ;;  %s1609_s27 = smov [#allocation5]   ;;  %s162_s25 = int_to_ptr.hbm [resolvable:$true] %s161_s25 }
   0xe   : > { %p1683_p8 = pnand %p1217_p5, %p150_p7  ;;  %s163_s28 = sshll.u32 %s1609_s27, 4  ;;  %s164_s28 = int_to_ptr.vmem [resolvable:$true] %s163_s28 }
   0xf   : > { %s176_s5 = sshll.u32 %s2433_s2, 4  ;;  %s1610_s6 = smov 128   ;;  %s177_s5 = int_to_ptr.hbm [resolvable:$true] %s176_s5 }
  0x10   : > { %p1353_p9 = pneg %p1683_p8  ;;  %s1611_s7 = smov 8  }
  0x11   : > { %s1612_s8 = smov [#allocation7]   ;;  %s1699_s10 = sadd.s32 1, %s1607_s18  }
  0x12   : > { %p1354_p10 = pnand %p1353_p9, %p46_p1  ;;  %s178_s9 = sshll.u32 %s1612_s8, 4  ;;  %s179_s9 = int_to_ptr.vmem [resolvable:$true] %s178_s9 }
  0x13   : > { %s32_s11 = sadd.s32 1, %s1603_s17  ;;  %s29_s12 = ssub.s32 %s1607_s18, %s1699_s10 }
  0x14   : > { %1356 = dma.hbm_to_vmem [thread:$0]  (!%p1354_p10), %s162_s25, 2048, %s164_s28, [#allocation6], %s1610_s6, %s1610_s6, %s1611_s7  }
  0x15   : > { %1359 = dma.hbm_to_vmem [thread:$0]  (!%p1354_p10), %s177_s5, 32, %s179_s9, [#allocation6]  }
  0x16   : > { %p39_p12 = scmp.ne.s32.totalorder %s1603_s17, %s1599_s16  ;;  %p30_p13 = scmp.eq.s32.totalorder %s29_s12, 0 }
  0x17   : > { %p40_p0 = scmp.eq.s32.totalorder %s1607_s18, 0  ;;  %p1373_p5 = scmp.lt.s32.totalorder %s1607_s18, 2 }
  0x18   : > { %p1709_p3 = por %p111_p2, %p39_p12  ;;  %s189_s20 = sand.u32 1, %s1603_s17  }
  0x19   : > { %s1715_s14 = scalar_select %p30_p13, %s1603_s17, %s32_s11  }
  0x1a   : > { %p41_p7 = por %p40_p0, %p39_p12  ;;  %s1221_s23 = sshll.u32 %s189_s20, 9 }
  0x1b   : > { %s1303_s24 = sshll.u32 %s1607_s18, 9  ;;  %s193_s29 = scalar_lea.vmem [#allocation2], %s1221_s23 }
  0x1c   : > { %s198_s28 = scalar_lea.hbm %s2431_s0, %s1303_s24  ;;  %s201_s30 = sshll.u32 %s193_s29, 4  ;;  %s202_s30 = int_to_ptr.vmem [resolvable:$true] %s201_s30 }
  0x1d   : > { %s199_s5 = sshll.u32 %s198_s28, 4  ;;  %p1722_p2 = pnand %p1373_p5, %p41_p7  ;;  %s200_s5 = int_to_ptr.hbm [resolvable:$true] %s199_s5 }
  0x1e   : > { %s190_s9 = scalar_lea.sflag [#allocation3], %s189_s20  ;;  %s1475_s11 = sshra.s32 %s200_s5, 4  ;;  %s1476_s11 = int_to_ptr.hbm [resolvable:$true] %s1475_s11 }
  0x1f   : > { %s1477_s12 = scalar_lea.hbm %s1476_s11, 512  ;;  %p1479_p10 = pneg %p1722_p2 }
  0x20   : > { %p1478_p9 = scmp.ne.s32.totalorder %s1476_s11, %s1477_s12  ;;  %s1482_s25 = scalar_lea.hbm %s2431_s0, 1024 }
  0x21   : > { %p1483_p0 = scmp.lt.s32.totalorder %s1476_s11, %s2431_s0  ;;  %p1484_p5 = scmp.lt.s32.totalorder %s1482_s25, %s1477_s12 }
  0x22   : > { %p1480_p12 = pnand %p1479_p10, %p1478_p9 }
  0x23   : > { %p1485_p7 = por %p1484_p5, %p1483_p0 }
  0x24   : > { %p1481_p13 = pneg %p1480_p12 }
  0x26   : > { %p1486_p11 = pnand %p1485_p7, %p1481_p13 }
  0x28   : > { %1489 = shalt.err (!%p1486_p11)
}
  0x29   : > { %1363 = dma.hbm_to_vmem [thread:$0]  (!%p1722_p2), %s200_s5, 8192, %s202_s30, %s190_s9, %s1610_s6, %s1610_s6, %s1611_s7  }
  0x2a   : > { %213 = sbr.rel (%p1683_p8) target bundleno = 534 (0x216), region = 32 }
  0x2f   : > { %s1742_s20 = sand.u32 1, %s1599_s16  }
  0x30   : > { %s1225_s29 = sshll.u32 %s1742_s20, 9  ;;  %s216_s11 = scalar_lea.sflag [#allocation3], %s1742_s20 }
  0x31   : > { %s1746_s12 = scalar_lea.vmem [#allocation2], %s1225_s29 }
  0x32   : > { %1578 = dma.done.wait (%p1670_p4), %s216_s11, 8192  }
  0x33   : > { %1580 = vsyncadd (%p1670_p4), %s216_s11, 4294959104 }
  0x34   : > { %1582 = dma.done.wait (%p46_p1), [#allocation6], 2080  }
  0x35   : > { %1584 = vsyncadd (%p46_p1), [#allocation6], 4294965216  ;;  %v1288_v0 = vld [vmem:[#allocation5 + $0x70] sm:$0xf]  ;;  %v1319_v1 = vld [vmem:[#allocation5 + $0x74] sm:$0xf0] }
  0x36   : > { %v1318_v2 = vld [vmem:[#allocation5 + $0x74] sm:$0xf]  ;;  %v1289_v3 = vor.u32 %v1319_v1, %v1288_v0  ;;  %v1290_v4 = vld [vmem:[#allocation5 + $0x78] sm:$0xf0]  ;;  %v1280_v5 = vld [vmem:[#allocation5 + $0x60] sm:$0xf] }
  0x37   : > { %v1317_v6 = vld [vmem:[#allocation5 + $0x64] sm:$0xf0]  ;;  %v1293_v7 = vor.u32 %v1318_v2, %v1290_v4  ;;  %v1316_v8 = vld [vmem:[#allocation5 + $0x64] sm:$0xf]  ;;  %v1282_v9 = vld [vmem:[#allocation5 + $0x68] sm:$0xf0] }
  0x38   : > { %460 = vmatpush.bf16.msra.mxu0 %v1289_v3  ;;  %v1281_v10 = vor.u32 %v1317_v6, %v1280_v5  ;;  %1323 = vmatpush.bf16.msra.mxu2 %v1289_v3  ;;  %v1285_v11 = vor.u32 %v1316_v8, %v1282_v9  ;;  %v1272_v12 = vld [vmem:[#allocation5 + $0x50] sm:$0xf]  ;;  %v1315_v13 = vld [vmem:[#allocation5 + $0x54] sm:$0xf0]  ;;  %v1314_v14 = vld [vmem:[#allocation5 + $0x54] sm:$0xf] }
  0x39   : > { %629 = vmatpush.bf16.msra.mxu1 %v1293_v7  ;;  %1331 = vmatpush.bf16.msra.mxu3 %v1293_v7  ;;  %v1274_v15 = vld [vmem:[#allocation5 + $0x58] sm:$0xf0]  ;;  %v1273_v16 = vor.u32 %v1315_v13, %v1272_v12  ;;  %v1264_v18 = vld [vmem:[#allocation5 + $0x40] sm:$0xf]  ;;  %v1313_v19 = vld [vmem:[#allocation5 + $0x44] sm:$0xf0] }
  0x3a   : > { %v1277_v17 = vor.u32 %v1314_v14, %v1274_v15  ;;  %v1312_v20 = vld [vmem:[#allocation5 + $0x44] sm:$0xf]  ;;  %v1266_v21 = vld [vmem:[#allocation5 + $0x48] sm:$0xf0]  ;;  %v1265_v22 = vor.u32 %v1313_v19, %v1264_v18  ;;  %v1256_v24 = vld [vmem:[#allocation5 + $0x30] sm:$0xf] }
  0x3b   : > { %v1269_v23 = vor.u32 %v1312_v20, %v1266_v21  ;;  %v1311_v25 = vld [vmem:[#allocation5 + $0x34] sm:$0xf0]  ;;  %v1310_v26 = vld [vmem:[#allocation5 + $0x34] sm:$0xf]  ;;  %v1258_v27 = vld [vmem:[#allocation5 + $0x38] sm:$0xf0] }
  0x3c   : > { %461 = vmatpush.bf16.msra.mxu0 %v1281_v10  ;;  %1324 = vmatpush.bf16.msra.mxu2 %v1281_v10  ;;  %v1257_v28 = vor.u32 %v1311_v25, %v1256_v24  ;;  %v1261_v29 = vor.u32 %v1310_v26, %v1258_v27  ;;  %v1248_v30 = vld [vmem:[#allocation5 + $0x20] sm:$0xf]  ;;  %v1309_v31 = vld [vmem:[#allocation5 + $0x24] sm:$0xf0]  ;;  %v1308_v32 = vld [vmem:[#allocation5 + $0x24] sm:$0xf] }
  0x3d   : > { %630 = vmatpush.bf16.msra.mxu1 %v1285_v11  ;;  %1332 = vmatpush.bf16.msra.mxu3 %v1285_v11  ;;  %v1250_v33 = vld [vmem:[#allocation5 + $0x28] sm:$0xf0]  ;;  %v1249_v34 = vor.u32 %v1309_v31, %v1248_v30  ;;  %v1240_v36 = vld [vmem:[#allocation5 + $0x10] sm:$0xf]  ;;  %v1307_v37 = vld [vmem:[#allocation5 + $0x14] sm:$0xf0] }
  0x3e   : > { %v1253_v35 = vor.u32 %v1308_v32, %v1250_v33  ;;  %v1306_v38 = vld [vmem:[#allocation5 + $0x14] sm:$0xf]  ;;  %v1242_v39 = vld [vmem:[#allocation5 + $0x18] sm:$0xf0]  ;;  %v1241_v40 = vor.u32 %v1307_v37, %v1240_v36  ;;  %v1232_v42 = vld [vmem:[#allocation5] sm:$0xf] }
  0x3f   : > { %v1245_v41 = vor.u32 %v1306_v38, %v1242_v39  ;;  %v1305_v43 = vld [vmem:[#allocation5 + $0x4] sm:$0xf0]  ;;  %v1304_v44 = vld [vmem:[#allocation5 + $0x4] sm:$0xf]  ;;  %v1234_v45 = vld [vmem:[#allocation5 + $0x8] sm:$0xf0] }
  0x40   : > { %462 = vmatpush.bf16.msra.mxu0 %v1273_v16  ;;  %1325 = vmatpush.bf16.msra.mxu2 %v1273_v16  ;;  %v1233_v46 = vor.u32 %v1305_v43, %v1232_v42  ;;  %v262_v47 = vld [vmem:[%s1746_s12] sm:$0xff]  ;;  %v263_v48 = vld [vmem:[%s1746_s12 + $0x8] sm:$0xff]  ;;  %v1237_v49 = vor.u32 %v1304_v44, %v1234_v45  ;;  %v264_v51 = vld [vmem:[%s1746_s12 + $0x10] sm:$0xff]  ;;  %s1228_s21 = sshll.u32 %s1742_s20, 10  ;;  %s1321_s6 = sshll.u32 %s1661_s19, 10 }
  0x41   : > { %631 = vmatpush.bf16.msra.mxu1 %v1277_v17  ;;  %1333 = vmatpush.bf16.msra.mxu3 %v1277_v17  ;;  %v326_v50 = vpack.c.bf16 %v263_v48, %v262_v47  ;;  %v265_v52 = vld [vmem:[%s1746_s12 + $0x18] sm:$0xff]  ;;  %v294_v54 = vld [vmem:[%s1746_s12 + $0x100] sm:$0xff]  ;;  %v295_v55 = vld [vmem:[%s1746_s12 + $0x108] sm:$0xff]  ;;  %s1795_s26 = scalar_lea.vmem [#allocation8], %s1228_s21  ;;  %s1072_s5 = scalar_lea.hbm %s2434_s3, %s1321_s6 }
  0x42   : > { %v327_v53 = vpack.c.bf16 %v265_v52, %v264_v51  ;;  %v342_v56 = vpack.c.bf16 %v295_v55, %v294_v54  ;;  %v266_v57 = vld [vmem:[%s1746_s12 + $0x20] sm:$0xff]  ;;  %v267_v58 = vld [vmem:[%s1746_s12 + $0x28] sm:$0xff]  ;;  %v296_v60 = vld [vmem:[%s1746_s12 + $0x110] sm:$0xff]  ;;  %s1073_s8 = sshll.u32 %s1795_s26, 4  ;;  %s1075_s9 = sshll.u32 %s1072_s5, 4  ;;  %s1074_s8 = int_to_ptr.vmem [resolvable:$true] %s1073_s8  ;;  %s1076_s9 = int_to_ptr.hbm [resolvable:$true] %s1075_s9 }
  0x43   : > { %v328_v59 = vpack.c.bf16 %v267_v58, %v266_v57  ;;  %v297_v61 = vld [vmem:[%s1746_s12 + $0x118] sm:$0xff]  ;;  %v268_v63 = vld [vmem:[%s1746_s12 + $0x30] sm:$0xff]  ;;  %v298_v2 = vld [vmem:[%s1746_s12 + $0x120] sm:$0xff]  ;;  %s1055_s24 = scalar_lea.sflag [#allocation4], %s1742_s20  ;;  %s1519_s23 = sshra.s32 %s1076_s9, 4  ;;  %s1520_s23 = int_to_ptr.hbm [resolvable:$true] %s1519_s23 }
  0x44   : > { %463 = vmatpush.bf16.msra.mxu0 %v1265_v22  ;;  %1326 = vmatpush.bf16.msra.mxu2 %v1265_v22  ;;  %v343_v62 = vpack.c.bf16 %v297_v61, %v296_v60  ;;  %v269_v0 = vld [vmem:[%s1746_s12 + $0x38] sm:$0xff]  ;;  %v299_v3 = vld [vmem:[%s1746_s12 + $0x128] sm:$0xff]  ;;  %v270_v5 = vld [vmem:[%s1746_s12 + $0x40] sm:$0xff]  ;;  %s1521_s25 = scalar_lea.hbm %s1520_s23, 1024  ;;  %s1525_s29 = scalar_lea.hbm %s2434_s3, 2048 }
  0x45   : > { %632 = vmatpush.bf16.msra.mxu1 %v1269_v23  ;;  %1334 = vmatpush.bf16.msra.mxu3 %v1269_v23  ;;  %v329_v1 = vpack.c.bf16 %v269_v0, %v268_v63  ;;  %v344_v4 = vpack.c.bf16 %v299_v3, %v298_v2  ;;  %v271_v6 = vld [vmem:[%s1746_s12 + $0x48] sm:$0xff]  ;;  %v300_v8 = vld [vmem:[%s1746_s12 + $0x130] sm:$0xff]  ;;  %v301_v9 = vld [vmem:[%s1746_s12 + $0x138] sm:$0xff]  ;;  %p1522_p1 = scmp.ne.s32.totalorder %s1520_s23, %s1521_s25  ;;  %p1526_p11 = scmp.lt.s32.totalorder %s1520_s23, %s2434_s3 }
  0x46   : > { %v330_v7 = vpack.c.bf16 %v271_v6, %v270_v5  ;;  %v345_v10 = vpack.c.bf16 %v301_v9, %v300_v8  ;;  %v272_v11 = vld [vmem:[%s1746_s12 + $0x50] sm:$0xff]  ;;  %v273_v12 = vld [vmem:[%s1746_s12 + $0x58] sm:$0xff]  ;;  %v302_v14 = vld [vmem:[%s1746_s12 + $0x140] sm:$0xff]  ;;  %p1527_p2 = scmp.lt.s32.totalorder %s1525_s29, %s1521_s25 }
  0x47   : > { %v331_v13 = vpack.c.bf16 %v273_v12, %v272_v11  ;;  %v303_v15 = vld [vmem:[%s1746_s12 + $0x148] sm:$0xff]  ;;  %v274_v17 = vld [vmem:[%s1746_s12 + $0x60] sm:$0xff]  ;;  %v304_v20 = vld [vmem:[%s1746_s12 + $0x150] sm:$0xff]  ;;  %p1523_p4 = pnand %p1522_p1, %p1709_p3 }
  0x48   : > { %464 = vmatpush.bf16.msra.mxu0 %v1257_v28  ;;  %1327 = vmatpush.bf16.msra.mxu2 %v1257_v28  ;;  %v346_v16 = vpack.c.bf16 %v303_v15, %v302_v14  ;;  %v275_v18 = vld [vmem:[%s1746_s12 + $0x68] sm:$0xff]  ;;  %v305_v21 = vld [vmem:[%s1746_s12 + $0x158] sm:$0xff]  ;;  %v276_v23 = vld [vmem:[%s1746_s12 + $0x70] sm:$0xff]  ;;  %p1528_p9 = por %p1527_p2, %p1526_p11 }
  0x49   : > { %633 = vmatpush.bf16.msra.mxu1 %v1261_v29  ;;  %1335 = vmatpush.bf16.msra.mxu3 %v1261_v29  ;;  %v332_v19 = vpack.c.bf16 %v275_v18, %v274_v17  ;;  %v347_v22 = vpack.c.bf16 %v305_v21, %v304_v20  ;;  %v277_v24 = vld [vmem:[%s1746_s12 + $0x78] sm:$0xff]  ;;  %v306_v26 = vld [vmem:[%s1746_s12 + $0x160] sm:$0xff]  ;;  %v307_v27 = vld [vmem:[%s1746_s12 + $0x168] sm:$0xff]  ;;  %p1524_p8 = pneg %p1523_p4 }
  0x4a   : > { %v333_v25 = vpack.c.bf16 %v277_v24, %v276_v23  ;;  %v348_v28 = vpack.c.bf16 %v307_v27, %v306_v26  ;;  %v374_v29 = vld [vmem:[#allocation7] sm:$0x3]  ;;  %v279_v31 = vld [vmem:[%s1746_s12 + $0x88] sm:$0xff]  ;;  %v308_v39 = vld [vmem:[%s1746_s12 + $0x170] sm:$0xff] }
  0x4b   : > { %v278_v30 = vld [vmem:[%s1746_s12 + $0x80] sm:$0xff]  ;;  %v1789_v32 = vperm.slane %v374_v29, 0  ;;  %v1791_v33 = vperm.slane %v374_v29, 1  ;;  %v280_v48 = vld [vmem:[%s1746_s12 + $0x90] sm:$0xff]  ;;  %v311_v57 = vld [vmem:[%s1746_s12 + $0x188] sm:$0xff]  ;;  %p1529_p10 = pnand %p1528_p9, %p1524_p8 }
  0x4c   : > { %465 = vmatpush.bf16.msra.mxu0 %v1249_v34  ;;  %1328 = vmatpush.bf16.msra.mxu2 %v1249_v34  ;;  %v334_v34 = vpack.c.bf16 %v279_v31, %v278_v30  ;;  %v282_v5 = vld [vmem:[%s1746_s12 + $0xa0] sm:$0xff]  ;;  %v283_v6 = vld [vmem:[%s1746_s12 + $0xa8] sm:$0xff]  ;;  %v312_v18 = vld [vmem:[%s1746_s12 + $0x190] sm:$0xff] }
  0x4d   : > { %634 = vmatpush.bf16.msra.mxu1 %v1253_v35  ;;  %1336 = vmatpush.bf16.msra.mxu3 %v1253_v35  ;;  %v336_v8 = vpack.c.bf16 %v283_v6, %v282_v5  ;;  %v284_v31 = vld [vmem:[%s1746_s12 + $0xb0] sm:$0xff] }
  0x50   : > { %466 = vmatpush.bf16.msra.mxu0 %v1241_v40  ;;  %1329 = vmatpush.bf16.msra.mxu2 %v1241_v40  ;;  %v309_v40 = vld [vmem:[%s1746_s12 + $0x178] sm:$0xff] }
  0x51   : > { %635 = vmatpush.bf16.msra.mxu1 %v1245_v41  ;;  %1337 = vmatpush.bf16.msra.mxu3 %v1245_v41  ;;  %v349_v41 = vpack.c.bf16 %v309_v40, %v308_v39 }
  0x54   : > { %467 = vmatpush.bf16.msra.mxu0 %v1233_v46  ;;  %1330 = vmatpush.bf16.msra.mxu2 %v1233_v46 }
  0x55   : > { %636 = vmatpush.bf16.msra.mxu1 %v1237_v49  ;;  %1338 = vmatpush.bf16.msra.mxu3 %v1237_v49  ;;  %v281_v49 = vld [vmem:[%s1746_s12 + $0x98] sm:$0xff] }
  0x57   : > { %468 = vmatmul.bf16.vlgmr.msra.gmra.mxu0 %v326_v50  ;;  %548 = vmatmul.bf16.vlgmr.msra.gmra.mxu2 %v342_v56 }
  0x58   : > { %637 = vmatmul.bf16.vlgmr.msra.gmra.mxu1 %v326_v50  ;;  %717 = vmatmul.bf16.vlgmr.msra.gmra.mxu3 %v342_v56  ;;  %v335_v50 = vpack.c.bf16 %v281_v49, %v280_v48  ;;  %v310_v56 = vld [vmem:[%s1746_s12 + $0x180] sm:$0xff] }
  0x67   : > { %473 = vmatmul.bf16.gmra.mxu0 %v327_v53  ;;  %553 = vmatmul.bf16.gmra.mxu2 %v343_v62 }
  0x68   : > { %642 = vmatmul.bf16.gmra.mxu1 %v327_v53  ;;  %722 = vmatmul.bf16.gmra.mxu3 %v343_v62 }
  0x77   : > { %478 = vmatmul.bf16.gmra.mxu0 %v328_v59  ;;  %558 = vmatmul.bf16.gmra.mxu2 %v344_v4 }
  0x78   : > { %647 = vmatmul.bf16.gmra.mxu1 %v328_v59  ;;  %727 = vmatmul.bf16.gmra.mxu3 %v344_v4  ;;  %v350_v59 = vpack.c.bf16 %v311_v57, %v310_v56 }
  0x87   : > { %483 = vmatmul.bf16.gmra.mxu0 %v329_v1  ;;  %563 = vmatmul.bf16.gmra.mxu2 %v345_v10 }
  0x88   : > { %652 = vmatmul.bf16.gmra.mxu1 %v329_v1  ;;  %732 = vmatmul.bf16.gmra.mxu3 %v345_v10 }
  0x97   : > { %488 = vmatmul.bf16.gmra.mxu0 %v330_v7  ;;  %568 = vmatmul.bf16.gmra.mxu2 %v346_v16 }
  0x98   : > { %657 = vmatmul.bf16.gmra.mxu1 %v330_v7  ;;  %737 = vmatmul.bf16.gmra.mxu3 %v346_v16 }
  0xa7   : > { %493 = vmatmul.bf16.gmra.mxu0 %v331_v13  ;;  %573 = vmatmul.bf16.gmra.mxu2 %v347_v22 }
  0xa8   : > { %662 = vmatmul.bf16.gmra.mxu1 %v331_v13  ;;  %742 = vmatmul.bf16.gmra.mxu3 %v347_v22 }
  0xb7   : > { %498 = vmatmul.bf16.gmra.mxu0 %v332_v19  ;;  %578 = vmatmul.bf16.gmra.mxu2 %v348_v28 }
  0xb8   : > { %667 = vmatmul.bf16.gmra.mxu1 %v332_v19  ;;  %747 = vmatmul.bf16.gmra.mxu3 %v348_v28  ;;  %v313_v19 = vld [vmem:[%s1746_s12 + $0x198] sm:$0xff] }
  0xb9   : > { %v351_v21 = vpack.c.bf16 %v313_v19, %v312_v18 }
  0xc7   : > { %503 = vmatmul.bf16.gmra.mxu0 %v333_v25  ;;  %583 = vmatmul.bf16.gmra.mxu2 %v349_v41 }
  0xc8   : > { %672 = vmatmul.bf16.gmra.mxu1 %v333_v25  ;;  %752 = vmatmul.bf16.gmra.mxu3 %v349_v41 }
  0xd4   : > { %v469_v35 = vpop.f32.mrf.mxu0 }
  0xd5   : > { %v470_v36 = vadd.f32 %v469_v35, %v1789_v32  ;;  %v638_v37 = vpop.f32.mrf.mxu1 }
  0xd6   : > { %v639_v38 = vadd.f32 %v638_v37, %v1791_v33 }
  0xd7   : > { %798 = vst [vmem:[%s1795_s26] sm:$0xff] %v470_v36  ;;  %508 = vmatmul.bf16.gmra.mxu0 %v334_v34  ;;  %588 = vmatmul.bf16.gmra.mxu2 %v350_v59 }
  0xd8   : > { %799 = vst [vmem:[%s1795_s26 + $0x8] sm:$0xff] %v639_v38  ;;  %677 = vmatmul.bf16.gmra.mxu1 %v334_v34  ;;  %757 = vmatmul.bf16.gmra.mxu3 %v350_v59  ;;  %v285_v34 = vld [vmem:[%s1746_s12 + $0xb8] sm:$0xff]  ;;  %v286_v59 = vld [vmem:[%s1746_s12 + $0xc0] sm:$0xff] }
  0xda   : > { %v549_v63 = vpop.f32.mrf.mxu2 }
  0xdb   : > { %v718_v1 = vpop.f32.mrf.mxu3  ;;  %v1817_v3 = vadd.f32 %v549_v63, %v1789_v32 }
  0xdc   : > { %v471_v42 = vpop.f32.mrf.mxu0  ;;  %v1823_v7 = vadd.f32 %v718_v1, %v1791_v33 }
  0xdd   : > { %v472_v43 = vadd.f32 %v471_v42, %v1789_v32  ;;  %v640_v44 = vpop.f32.mrf.mxu1  ;;  %862 = vst [vmem:[%s1795_s26 + $0x200] sm:$0xff] %v1817_v3 }
  0xde   : > { %v641_v45 = vadd.f32 %v640_v44, %v1791_v33  ;;  %863 = vst [vmem:[%s1795_s26 + $0x208] sm:$0xff] %v1823_v7 }
  0xdf   : > { %800 = vst [vmem:[%s1795_s26 + $0x10] sm:$0xff] %v472_v43  ;;  %v926_v46 = vadd.f32 %v472_v43, %v470_v36  ;;  %v337_v36 = vpack.c.bf16 %v285_v34, %v284_v31 }
  0xe0   : > { %801 = vst [vmem:[%s1795_s26 + $0x18] sm:$0xff] %v641_v45  ;;  %v989_v47 = vadd.f32 %v641_v45, %v639_v38 }
  0xe2   : > { %v551_v12 = vpop.f32.mrf.mxu2 }
  0xe3   : > { %v1832_v14 = vadd.f32 %v551_v12, %v1789_v32  ;;  %v720_v15 = vpop.f32.mrf.mxu3 }
  0xe4   : > { %v474_v51 = vpop.f32.mrf.mxu0  ;;  %v1836_v17 = vadd.f32 %v720_v15, %v1791_v33 }
  0xe5   : > { %v475_v52 = vadd.f32 %v474_v51, %v1789_v32  ;;  %v643_v53 = vpop.f32.mrf.mxu1  ;;  %864 = vst [vmem:[%s1795_s26 + $0x210] sm:$0xff] %v1832_v14 }
  0xe6   : > { %v644_v54 = vadd.f32 %v643_v53, %v1791_v33  ;;  %865 = vst [vmem:[%s1795_s26 + $0x218] sm:$0xff] %v1836_v17 }
  0xe7   : > { %802 = vst [vmem:[%s1795_s26 + $0x20] sm:$0xff] %v475_v52  ;;  %v927_v55 = vadd.f32 %v926_v46, %v475_v52  ;;  %513 = vmatmul.bf16.gmra.mxu0 %v335_v50  ;;  %593 = vmatmul.bf16.gmra.mxu2 %v351_v21  ;;  %v314_v46 = vld [vmem:[%s1746_s12 + $0x1a0] sm:$0xff] }
  0xe8   : > { %803 = vst [vmem:[%s1795_s26 + $0x28] sm:$0xff] %v644_v54  ;;  %v990_v58 = vadd.f32 %v989_v47, %v644_v54  ;;  %682 = vmatmul.bf16.gmra.mxu1 %v335_v50  ;;  %762 = vmatmul.bf16.gmra.mxu3 %v351_v21  ;;  %v315_v47 = vld [vmem:[%s1746_s12 + $0x1a8] sm:$0xff] }
  0xe9   : > { %v352_v49 = vpack.c.bf16 %v315_v47, %v314_v46 }
  0xea   : > { %v554_v25 = vpop.f32.mrf.mxu2 }
  0xeb   : > { %v723_v27 = vpop.f32.mrf.mxu3  ;;  %v1849_v29 = vadd.f32 %v554_v25, %v1789_v32  ;;  %v288_v25 = vld [vmem:[%s1746_s12 + $0xd0] sm:$0xff] }
  0xec   : > { %v476_v60 = vpop.f32.mrf.mxu0  ;;  %v1855_v35 = vadd.f32 %v723_v27, %v1791_v33 }
  0xed   : > { %v477_v61 = vadd.f32 %v476_v60, %v1789_v32  ;;  %v645_v62 = vpop.f32.mrf.mxu1  ;;  %866 = vst [vmem:[%s1795_s26 + $0x220] sm:$0xff] %v1849_v29  ;;  %v287_v60 = vld [vmem:[%s1746_s12 + $0xc8] sm:$0xff] }
  0xee   : > { %v646_v0 = vadd.f32 %v645_v62, %v1791_v33  ;;  %867 = vst [vmem:[%s1795_s26 + $0x228] sm:$0xff] %v1855_v35  ;;  %v338_v62 = vpack.c.bf16 %v287_v60, %v286_v59  ;;  %v291_v59 = vld [vmem:[%s1746_s12 + $0xe8] sm:$0xff] }
  0xef   : > { %804 = vst [vmem:[%s1795_s26 + $0x30] sm:$0xff] %v477_v61  ;;  %v928_v2 = vadd.f32 %v927_v55, %v477_v61 }
  0xf0   : > { %805 = vst [vmem:[%s1795_s26 + $0x38] sm:$0xff] %v646_v0  ;;  %v991_v4 = vadd.f32 %v990_v58, %v646_v0 }
  0xf2   : > { %v556_v40 = vpop.f32.mrf.mxu2 }
  0xf3   : > { %v1864_v42 = vadd.f32 %v556_v40, %v1789_v32  ;;  %v725_v43 = vpop.f32.mrf.mxu3 }
  0xf4   : > { %v479_v9 = vpop.f32.mrf.mxu0  ;;  %v1868_v45 = vadd.f32 %v725_v43, %v1791_v33  ;;  %v318_v43 = vld [vmem:[%s1746_s12 + $0x1c0] sm:$0xff] }
  0xf5   : > { %v480_v10 = vadd.f32 %v479_v9, %v1789_v32  ;;  %v648_v11 = vpop.f32.mrf.mxu1  ;;  %868 = vst [vmem:[%s1795_s26 + $0x230] sm:$0xff] %v1864_v42 }
  0xf6   : > { %v649_v13 = vadd.f32 %v648_v11, %v1791_v33  ;;  %869 = vst [vmem:[%s1795_s26 + $0x238] sm:$0xff] %v1868_v45  ;;  %v317_v11 = vld [vmem:[%s1746_s12 + $0x1b8] sm:$0xff] }
  0xf7   : > { %806 = vst [vmem:[%s1795_s26 + $0x40] sm:$0xff] %v480_v10  ;;  %v929_v16 = vadd.f32 %v928_v2, %v480_v10  ;;  %518 = vmatmul.bf16.gmra.mxu0 %v336_v8  ;;  %598 = vmatmul.bf16.gmra.mxu2 %v352_v49  ;;  %v316_v10 = vld [vmem:[%s1746_s12 + $0x1b0] sm:$0xff] }
  0xf8   : > { %807 = vst [vmem:[%s1795_s26 + $0x48] sm:$0xff] %v649_v13  ;;  %v992_v20 = vadd.f32 %v991_v4, %v649_v13  ;;  %687 = vmatmul.bf16.gmra.mxu1 %v336_v8  ;;  %767 = vmatmul.bf16.gmra.mxu3 %v352_v49  ;;  %v353_v13 = vpack.c.bf16 %v317_v11, %v316_v10 }
  0xfa   : > { %v559_v53 = vpop.f32.mrf.mxu2 }
  0xfb   : > { %v728_v55 = vpop.f32.mrf.mxu3  ;;  %v1881_v57 = vadd.f32 %v559_v53, %v1789_v32 }
  0xfc   : > { %v481_v22 = vpop.f32.mrf.mxu0  ;;  %v1887_v61 = vadd.f32 %v728_v55, %v1791_v33 }
  0xfd   : > { %v482_v23 = vadd.f32 %v481_v22, %v1789_v32  ;;  %v650_v24 = vpop.f32.mrf.mxu1  ;;  %870 = vst [vmem:[%s1795_s26 + $0x240] sm:$0xff] %v1881_v57 }
  0xfe   : > { %v651_v26 = vadd.f32 %v650_v24, %v1791_v33  ;;  %871 = vst [vmem:[%s1795_s26 + $0x248] sm:$0xff] %v1887_v61 }
  0xff   : > { %808 = vst [vmem:[%s1795_s26 + $0x50] sm:$0xff] %v482_v23  ;;  %v930_v28 = vadd.f32 %v929_v16, %v482_v23 }
 0x100   : > { %809 = vst [vmem:[%s1795_s26 + $0x58] sm:$0xff] %v651_v26  ;;  %v993_v30 = vadd.f32 %v992_v20, %v651_v26  ;;  %v289_v26 = vld [vmem:[%s1746_s12 + $0xd8] sm:$0xff] }
 0x102   : > { %v561_v2 = vpop.f32.mrf.mxu2 }
 0x103   : > { %v1896_v5 = vadd.f32 %v561_v2, %v1789_v32  ;;  %v730_v6 = vpop.f32.mrf.mxu3 }
 0x104   : > { %v484_v37 = vpop.f32.mrf.mxu0  ;;  %v1900_v9 = vadd.f32 %v730_v6, %v1791_v33 }
 0x105   : > { %v485_v38 = vadd.f32 %v484_v37, %v1789_v32  ;;  %v653_v39 = vpop.f32.mrf.mxu1  ;;  %872 = vst [vmem:[%s1795_s26 + $0x250] sm:$0xff] %v1896_v5 }
 0x106   : > { %v654_v41 = vadd.f32 %v653_v39, %v1791_v33  ;;  %873 = vst [vmem:[%s1795_s26 + $0x258] sm:$0xff] %v1900_v9 }
 0x107   : > { %810 = vst [vmem:[%s1795_s26 + $0x60] sm:$0xff] %v485_v38  ;;  %v931_v44 = vadd.f32 %v930_v28, %v485_v38  ;;  %523 = vmatmul.bf16.gmra.mxu0 %v337_v36  ;;  %603 = vmatmul.bf16.gmra.mxu2 %v353_v13  ;;  %v339_v28 = vpack.c.bf16 %v289_v26, %v288_v25 }
 0x108   : > { %811 = vst [vmem:[%s1795_s26 + $0x68] sm:$0xff] %v654_v41  ;;  %v994_v48 = vadd.f32 %v993_v30, %v654_v41  ;;  %692 = vmatmul.bf16.gmra.mxu1 %v337_v36  ;;  %772 = vmatmul.bf16.gmra.mxu3 %v353_v13  ;;  %v321_v13 = vld [vmem:[%s1746_s12 + $0x1d8] sm:$0xff] }
 0x10a   : > { %v564_v19 = vpop.f32.mrf.mxu2 }
 0x10b   : > { %v733_v21 = vpop.f32.mrf.mxu3  ;;  %v1913_v23 = vadd.f32 %v564_v19, %v1789_v32 }
 0x10c   : > { %v486_v50 = vpop.f32.mrf.mxu0  ;;  %v1919_v27 = vadd.f32 %v733_v21, %v1791_v33 }
 0x10d   : > { %v487_v51 = vadd.f32 %v486_v50, %v1789_v32  ;;  %v655_v52 = vpop.f32.mrf.mxu1  ;;  %874 = vst [vmem:[%s1795_s26 + $0x260] sm:$0xff] %v1913_v23 }
 0x10e   : > { %v656_v54 = vadd.f32 %v655_v52, %v1791_v33  ;;  %875 = vst [vmem:[%s1795_s26 + $0x268] sm:$0xff] %v1919_v27 }
 0x10f   : > { %812 = vst [vmem:[%s1795_s26 + $0x70] sm:$0xff] %v487_v51  ;;  %v932_v56 = vadd.f32 %v931_v44, %v487_v51  ;;  %v319_v44 = vld [vmem:[%s1746_s12 + $0x1c8] sm:$0xff] }
 0x110   : > { %813 = vst [vmem:[%s1795_s26 + $0x78] sm:$0xff] %v656_v54  ;;  %v995_v58 = vadd.f32 %v994_v48, %v656_v54  ;;  %v354_v47 = vpack.c.bf16 %v319_v44, %v318_v43 }
 0x112   : > { %v566_v36 = vpop.f32.mrf.mxu2 }
 0x113   : > { %v1928_v38 = vadd.f32 %v566_v36, %v1789_v32  ;;  %v735_v39 = vpop.f32.mrf.mxu3 }
 0x114   : > { %v489_v63 = vpop.f32.mrf.mxu0  ;;  %v1932_v41 = vadd.f32 %v735_v39, %v1791_v33 }
 0x115   : > { %v490_v0 = vadd.f32 %v489_v63, %v1789_v32  ;;  %v658_v1 = vpop.f32.mrf.mxu1  ;;  %876 = vst [vmem:[%s1795_s26 + $0x270] sm:$0xff] %v1928_v38 }
 0x116   : > { %v659_v4 = vadd.f32 %v658_v1, %v1791_v33  ;;  %877 = vst [vmem:[%s1795_s26 + $0x278] sm:$0xff] %v1932_v41 }
 0x117   : > { %814 = vst [vmem:[%s1795_s26 + $0x80] sm:$0xff] %v490_v0  ;;  %v933_v8 = vadd.f32 %v932_v56, %v490_v0  ;;  %528 = vmatmul.bf16.gmra.mxu0 %v338_v62  ;;  %608 = vmatmul.bf16.gmra.mxu2 %v354_v47 }
 0x118   : > { %815 = vst [vmem:[%s1795_s26 + $0x88] sm:$0xff] %v659_v4  ;;  %v996_v12 = vadd.f32 %v995_v58, %v659_v4  ;;  %697 = vmatmul.bf16.gmra.mxu1 %v338_v62  ;;  %777 = vmatmul.bf16.gmra.mxu3 %v354_v47  ;;  %v290_v58 = vld [vmem:[%s1746_s12 + $0xe0] sm:$0xff] }
 0x119   : > { %v340_v62 = vpack.c.bf16 %v291_v59, %v290_v58 }
 0x11a   : > { %v569_v51 = vpop.f32.mrf.mxu2 }
 0x11b   : > { %v738_v53 = vpop.f32.mrf.mxu3  ;;  %v1945_v55 = vadd.f32 %v569_v51, %v1789_v32  ;;  %v323_v51 = vld [vmem:[%s1746_s12 + $0x1e8] sm:$0xff] }
 0x11c   : > { %v491_v15 = vpop.f32.mrf.mxu0  ;;  %v1951_v60 = vadd.f32 %v738_v53, %v1791_v33 }
 0x11d   : > { %v492_v16 = vadd.f32 %v491_v15, %v1789_v32  ;;  %v660_v18 = vpop.f32.mrf.mxu1  ;;  %878 = vst [vmem:[%s1795_s26 + $0x280] sm:$0xff] %v1945_v55 }
 0x11e   : > { %v661_v20 = vadd.f32 %v660_v18, %v1791_v33  ;;  %879 = vst [vmem:[%s1795_s26 + $0x288] sm:$0xff] %v1951_v60 }
 0x11f   : > { %816 = vst [vmem:[%s1795_s26 + $0x90] sm:$0xff] %v492_v16  ;;  %v934_v22 = vadd.f32 %v933_v8, %v492_v16 }
 0x120   : > { %817 = vst [vmem:[%s1795_s26 + $0x98] sm:$0xff] %v661_v20  ;;  %v997_v24 = vadd.f32 %v996_v12, %v661_v20  ;;  %v320_v12 = vld [vmem:[%s1746_s12 + $0x1d0] sm:$0xff] }
 0x121   : > { %v355_v16 = vpack.c.bf16 %v321_v13, %v320_v12 }
 0x122   : > { %v571_v2 = vpop.f32.mrf.mxu2 }
 0x123   : > { %v1960_v6 = vadd.f32 %v571_v2, %v1789_v32  ;;  %v740_v8 = vpop.f32.mrf.mxu3 }
 0x124   : > { %v494_v30 = vpop.f32.mrf.mxu0  ;;  %v1964_v11 = vadd.f32 %v740_v8, %v1791_v33 }
 0x125   : > { %v495_v31 = vadd.f32 %v494_v30, %v1789_v32  ;;  %v663_v34 = vpop.f32.mrf.mxu1  ;;  %880 = vst [vmem:[%s1795_s26 + $0x290] sm:$0xff] %v1960_v6  ;;  %v292_v30 = vld [vmem:[%s1746_s12 + $0xf0] sm:$0xff] }
 0x126   : > { %v664_v37 = vadd.f32 %v663_v34, %v1791_v33  ;;  %881 = vst [vmem:[%s1795_s26 + $0x298] sm:$0xff] %v1964_v11 }
 0x127   : > { %818 = vst [vmem:[%s1795_s26 + $0xa0] sm:$0xff] %v495_v31  ;;  %v935_v40 = vadd.f32 %v934_v22, %v495_v31  ;;  %533 = vmatmul.bf16.gmra.mxu0 %v339_v28  ;;  %613 = vmatmul.bf16.gmra.mxu2 %v355_v16  ;;  %v293_v31 = vld [vmem:[%s1746_s12 + $0xf8] sm:$0xff] }
 0x128   : > { %819 = vst [vmem:[%s1795_s26 + $0xa8] sm:$0xff] %v664_v37  ;;  %v998_v46 = vadd.f32 %v997_v24, %v664_v37  ;;  %702 = vmatmul.bf16.gmra.mxu1 %v339_v28  ;;  %782 = vmatmul.bf16.gmra.mxu3 %v355_v16  ;;  %v341_v36 = vpack.c.bf16 %v293_v31, %v292_v30 }
 0x12a   : > { %v574_v21 = vpop.f32.mrf.mxu2 }
 0x12b   : > { %v743_v24 = vpop.f32.mrf.mxu3  ;;  %v1977_v26 = vadd.f32 %v574_v21, %v1789_v32  ;;  %v324_v21 = vld [vmem:[%s1746_s12 + $0x1f0] sm:$0xff] }
 0x12c   : > { %v496_v48 = vpop.f32.mrf.mxu0  ;;  %v1983_v34 = vadd.f32 %v743_v24, %v1791_v33 }
 0x12d   : > { %v497_v49 = vadd.f32 %v496_v48, %v1789_v32  ;;  %v665_v50 = vpop.f32.mrf.mxu1  ;;  %882 = vst [vmem:[%s1795_s26 + $0x2a0] sm:$0xff] %v1977_v26 }
 0x12e   : > { %v666_v52 = vadd.f32 %v665_v50, %v1791_v33  ;;  %883 = vst [vmem:[%s1795_s26 + $0x2a8] sm:$0xff] %v1983_v34  ;;  %v322_v50 = vld [vmem:[%s1746_s12 + $0x1e0] sm:$0xff] }
 0x12f   : > { %820 = vst [vmem:[%s1795_s26 + $0xb0] sm:$0xff] %v497_v49  ;;  %v936_v54 = vadd.f32 %v935_v40, %v497_v49  ;;  %v356_v53 = vpack.c.bf16 %v323_v51, %v322_v50 }
 0x130   : > { %821 = vst [vmem:[%s1795_s26 + $0xb8] sm:$0xff] %v666_v52  ;;  %v999_v56 = vadd.f32 %v998_v46, %v666_v52 }
 0x132   : > { %v576_v43 = vpop.f32.mrf.mxu2 }
 0x133   : > { %v1992_v46 = vadd.f32 %v576_v43, %v1789_v32  ;;  %v745_v47 = vpop.f32.mrf.mxu3 }
 0x134   : > { %v499_v63 = vpop.f32.mrf.mxu0  ;;  %v1996_v49 = vadd.f32 %v745_v47, %v1791_v33 }
 0x135   : > { %v500_v0 = vadd.f32 %v499_v63, %v1789_v32  ;;  %v668_v1 = vpop.f32.mrf.mxu1  ;;  %884 = vst [vmem:[%s1795_s26 + $0x2b0] sm:$0xff] %v1992_v46 }
 0x136   : > { %v669_v4 = vadd.f32 %v668_v1, %v1791_v33  ;;  %885 = vst [vmem:[%s1795_s26 + $0x2b8] sm:$0xff] %v1996_v49 }
 0x137   : > { %822 = vst [vmem:[%s1795_s26 + $0xc0] sm:$0xff] %v500_v0  ;;  %v937_v10 = vadd.f32 %v936_v54, %v500_v0  ;;  %538 = vmatmul.bf16.gmra.mxu0 %v340_v62  ;;  %618 = vmatmul.bf16.gmra.mxu2 %v356_v53 }
 0x138   : > { %823 = vst [vmem:[%s1795_s26 + $0xc8] sm:$0xff] %v669_v4  ;;  %v1000_v15 = vadd.f32 %v999_v56, %v669_v4  ;;  %707 = vmatmul.bf16.gmra.mxu1 %v340_v62  ;;  %787 = vmatmul.bf16.gmra.mxu3 %v356_v53 }
 0x13a   : > { %v579_v59 = vpop.f32.mrf.mxu2 }
 0x13b   : > { %v748_v63 = vpop.f32.mrf.mxu3  ;;  %v2009_v1 = vadd.f32 %v579_v59, %v1789_v32 }
 0x13c   : > { %v501_v18 = vpop.f32.mrf.mxu0  ;;  %v2013_v4 = vadd.f32 %v748_v63, %v1791_v33 }
 0x13d   : > { %v502_v19 = vadd.f32 %v501_v18, %v1789_v32  ;;  %v670_v20 = vpop.f32.mrf.mxu1  ;;  %886 = vst [vmem:[%s1795_s26 + $0x2c0] sm:$0xff] %v2009_v1 }
 0x13e   : > { %v671_v22 = vadd.f32 %v670_v20, %v1791_v33  ;;  %887 = vst [vmem:[%s1795_s26 + $0x2c8] sm:$0xff] %v2013_v4 }
 0x13f   : > { %824 = vst [vmem:[%s1795_s26 + $0xd0] sm:$0xff] %v502_v19  ;;  %v938_v25 = vadd.f32 %v937_v10, %v502_v19 }
 0x140   : > { %825 = vst [vmem:[%s1795_s26 + $0xd8] sm:$0xff] %v671_v22  ;;  %v1001_v28 = vadd.f32 %v1000_v15, %v671_v22  ;;  %v325_v22 = vld [vmem:[%s1746_s12 + $0x1f8] sm:$0xff] }
 0x142   : > { %v581_v13 = vpop.f32.mrf.mxu2 }
 0x143   : > { %v2022_v16 = vadd.f32 %v581_v13, %v1789_v32  ;;  %v750_v18 = vpop.f32.mrf.mxu3 }
 0x144   : > { %v504_v37 = vpop.f32.mrf.mxu0  ;;  %v2026_v20 = vadd.f32 %v750_v18, %v1791_v33 }
 0x145   : > { %v505_v39 = vadd.f32 %v504_v37, %v1789_v32  ;;  %v673_v40 = vpop.f32.mrf.mxu1  ;;  %888 = vst [vmem:[%s1795_s26 + $0x2d0] sm:$0xff] %v2022_v16 }
 0x146   : > { %v674_v44 = vadd.f32 %v673_v40, %v1791_v33  ;;  %889 = vst [vmem:[%s1795_s26 + $0x2d8] sm:$0xff] %v2026_v20 }
 0x147   : > { %826 = vst [vmem:[%s1795_s26 + $0xe0] sm:$0xff] %v505_v39  ;;  %v939_v48 = vadd.f32 %v938_v25, %v505_v39  ;;  %543 = vmatmul.bf16.gmra.mxu0 %v341_v36  ;;  %v357_v25 = vpack.c.bf16 %v325_v22, %v324_v21 }
 0x148   : > { %827 = vst [vmem:[%s1795_s26 + $0xe8] sm:$0xff] %v674_v44  ;;  %v1002_v52 = vadd.f32 %v1001_v28, %v674_v44  ;;  %712 = vmatmul.bf16.gmra.mxu1 %v341_v36 }
 0x149   : > { %623 = vmatmul.bf16.gmra.mxu2 %v357_v25  ;;  %792 = vmatmul.bf16.gmra.mxu3 %v357_v25 }
 0x14a   : > { %v584_v36 = vpop.f32.mrf.mxu2 }
 0x14b   : > { %v753_v39 = vpop.f32.mrf.mxu3  ;;  %v2039_v43 = vadd.f32 %v584_v36, %v1789_v32 }
 0x14c   : > { %v506_v54 = vpop.f32.mrf.mxu0  ;;  %v2043_v47 = vadd.f32 %v753_v39, %v1791_v33 }
 0x14d   : > { %v507_v56 = vadd.f32 %v506_v54, %v1789_v32  ;;  %v675_v58 = vpop.f32.mrf.mxu1  ;;  %890 = vst [vmem:[%s1795_s26 + $0x2e0] sm:$0xff] %v2039_v43 }
 0x14e   : > { %v676_v62 = vadd.f32 %v675_v58, %v1791_v33  ;;  %891 = vst [vmem:[%s1795_s26 + $0x2e8] sm:$0xff] %v2043_v47 }
 0x14f   : > { %828 = vst [vmem:[%s1795_s26 + $0xf0] sm:$0xff] %v507_v56  ;;  %v940_v0 = vadd.f32 %v939_v48, %v507_v56 }
 0x150   : > { %829 = vst [vmem:[%s1795_s26 + $0xf8] sm:$0xff] %v676_v62  ;;  %v1003_v2 = vadd.f32 %v1002_v52, %v676_v62 }
 0x152   : > { %v586_v52 = vpop.f32.mrf.mxu2 }
 0x153   : > { %v2052_v54 = vadd.f32 %v586_v52, %v1789_v32  ;;  %v755_v56 = vpop.f32.mrf.mxu3 }
 0x154   : > { %v509_v8 = vpop.f32.mrf.mxu0  ;;  %v2056_v59 = vadd.f32 %v755_v56, %v1791_v33 }
 0x155   : > { %v510_v10 = vadd.f32 %v509_v8, %v1789_v32  ;;  %v678_v12 = vpop.f32.mrf.mxu1  ;;  %892 = vst [vmem:[%s1795_s26 + $0x2f0] sm:$0xff] %v2052_v54 }
 0x156   : > { %v679_v15 = vadd.f32 %v678_v12, %v1791_v33  ;;  %893 = vst [vmem:[%s1795_s26 + $0x2f8] sm:$0xff] %v2056_v59 }
 0x157   : > { %830 = vst [vmem:[%s1795_s26 + $0x100] sm:$0xff] %v510_v10  ;;  %v941_v19 = vadd.f32 %v940_v0, %v510_v10 }
 0x158   : > { %831 = vst [vmem:[%s1795_s26 + $0x108] sm:$0xff] %v679_v15  ;;  %v1004_v24 = vadd.f32 %v1003_v2, %v679_v15 }
 0x15a   : > { %v589_v8 = vpop.f32.mrf.mxu2 }
 0x15b   : > { %v758_v12 = vpop.f32.mrf.mxu3  ;;  %v2067_v15 = vadd.f32 %v589_v8, %v1789_v32 }
 0x15c   : > { %v511_v28 = vpop.f32.mrf.mxu0 }
 0x15d   : > { %v512_v30 = vadd.f32 %v511_v28, %v1789_v32  ;;  %v680_v31 = vpop.f32.mrf.mxu1  ;;  %2459 = vst [vmem:[#allocation15_spill] sm:$0xff] %v2067_v15 }
 0x15e   : > { %v681_v37 = vadd.f32 %v680_v31, %v1791_v33  ;;  %894 = vst [vmem:[%s1795_s26 + $0x300] sm:$0xff] %v2067_v15 }
 0x15f   : > { %832 = vst [vmem:[%s1795_s26 + $0x110] sm:$0xff] %v512_v30  ;;  %v942_v40 = vadd.f32 %v941_v19, %v512_v30  ;;  %v2071_v19 = vadd.f32 %v758_v12, %v1791_v33 }
 0x160   : > { %833 = vst [vmem:[%s1795_s26 + $0x118] sm:$0xff] %v681_v37  ;;  %v1005_v44 = vadd.f32 %v1004_v24, %v681_v37 }
 0x161   : > { %2460 = vst [vmem:[#allocation16_spill] sm:$0xff] %v2071_v19 }
 0x162   : > { %895 = vst [vmem:[%s1795_s26 + $0x308] sm:$0xff] %v2071_v19  ;;  %v591_v25 = vpop.f32.mrf.mxu2 }
 0x163   : > { %v2080_v30 = vadd.f32 %v591_v25, %v1789_v32  ;;  %v760_v31 = vpop.f32.mrf.mxu3 }
 0x164   : > { %v514_v48 = vpop.f32.mrf.mxu0  ;;  %v2086_v37 = vadd.f32 %v760_v31, %v1791_v33 }
 0x165   : > { %v515_v50 = vadd.f32 %v514_v48, %v1789_v32  ;;  %v683_v51 = vpop.f32.mrf.mxu1  ;;  %2461 = vst [vmem:[#allocation17_spill] sm:$0xff] %v2080_v30 }
 0x166   : > { %v684_v53 = vadd.f32 %v683_v51, %v1791_v33  ;;  %2462 = vst [vmem:[#allocation18_spill] sm:$0xff] %v2086_v37 }
 0x167   : > { %834 = vst [vmem:[%s1795_s26 + $0x120] sm:$0xff] %v515_v50  ;;  %v943_v58 = vadd.f32 %v942_v40, %v515_v50 }
 0x168   : > { %835 = vst [vmem:[%s1795_s26 + $0x128] sm:$0xff] %v684_v53  ;;  %v1006_v62 = vadd.f32 %v1005_v44, %v684_v53 }
 0x169   : > { %896 = vst [vmem:[%s1795_s26 + $0x310] sm:$0xff] %v2080_v30 }
 0x16a   : > { %897 = vst [vmem:[%s1795_s26 + $0x318] sm:$0xff] %v2086_v37  ;;  %v594_v50 = vpop.f32.mrf.mxu2 }
 0x16b   : > { %v763_v52 = vpop.f32.mrf.mxu3  ;;  %v2104_v53 = vadd.f32 %v594_v50, %v1789_v32 }
 0x16c   : > { %v516_v63 = vpop.f32.mrf.mxu0  ;;  %v2109_v56 = vadd.f32 %v763_v52, %v1791_v33 }
 0x16d   : > { %v517_v0 = vadd.f32 %v516_v63, %v1789_v32  ;;  %v685_v2 = vpop.f32.mrf.mxu1  ;;  %2463 = vst [vmem:[#allocation19_spill] sm:$0xff] %v2104_v53 }
 0x16e   : > { %v686_v10 = vadd.f32 %v685_v2, %v1791_v33  ;;  %2464 = vst [vmem:[#allocation20_spill] sm:$0xff] %v2109_v56 }
 0x16f   : > { %836 = vst [vmem:[%s1795_s26 + $0x130] sm:$0xff] %v517_v0  ;;  %v944_v13 = vadd.f32 %v943_v58, %v517_v0 }
 0x170   : > { %837 = vst [vmem:[%s1795_s26 + $0x138] sm:$0xff] %v686_v10  ;;  %v1007_v18 = vadd.f32 %v1006_v62, %v686_v10 }
 0x171   : > { %898 = vst [vmem:[%s1795_s26 + $0x320] sm:$0xff] %v2104_v53 }
 0x172   : > { %899 = vst [vmem:[%s1795_s26 + $0x328] sm:$0xff] %v2109_v56  ;;  %v596_v0 = vpop.f32.mrf.mxu2 }
 0x173   : > { %v2122_v8 = vadd.f32 %v596_v0, %v1789_v32  ;;  %v765_v10 = vpop.f32.mrf.mxu3 }
 0x174   : > { %v519_v21 = vpop.f32.mrf.mxu0  ;;  %v2127_v12 = vadd.f32 %v765_v10, %v1791_v33 }
 0x175   : > { %v520_v22 = vadd.f32 %v519_v21, %v1789_v32  ;;  %v688_v24 = vpop.f32.mrf.mxu1  ;;  %2465 = vst [vmem:[#allocation21_spill] sm:$0xff] %v2122_v8 }
 0x176   : > { %v689_v28 = vadd.f32 %v688_v24, %v1791_v33  ;;  %2466 = vst [vmem:[#allocation22_spill] sm:$0xff] %v2127_v12 }
 0x177   : > { %838 = vst [vmem:[%s1795_s26 + $0x140] sm:$0xff] %v520_v22  ;;  %v2083_v36 = vadd.f32 %v944_v13, %v520_v22 }
 0x178   : > { %839 = vst [vmem:[%s1795_s26 + $0x148] sm:$0xff] %v689_v28  ;;  %v2089_v39 = vadd.f32 %v1007_v18, %v689_v28 }
 0x179   : > { %900 = vst [vmem:[%s1795_s26 + $0x330] sm:$0xff] %v2122_v8 }
 0x17a   : > { %901 = vst [vmem:[%s1795_s26 + $0x338] sm:$0xff] %v2127_v12  ;;  %v599_v22 = vpop.f32.mrf.mxu2 }
 0x17b   : > { %v768_v25 = vpop.f32.mrf.mxu3  ;;  %v2144_v28 = vadd.f32 %v599_v22, %v1789_v32 }
 0x17c   : > { %v521_v40 = vpop.f32.mrf.mxu0  ;;  %v2149_v31 = vadd.f32 %v768_v25, %v1791_v33 }
 0x17d   : > { %v2096_v44 = vadd.f32 %v521_v40, %v1789_v32  ;;  %v690_v48 = vpop.f32.mrf.mxu1  ;;  %2467 = vst [vmem:[#allocation23_spill] sm:$0xff] %v2144_v28 }
 0x17e   : > { %v2099_v51 = vadd.f32 %v690_v48, %v1791_v33  ;;  %2468 = vst [vmem:[#allocation24_spill] sm:$0xff] %v2149_v31 }
 0x17f   : > { %840 = vst [vmem:[%s1795_s26 + $0x150] sm:$0xff] %v2096_v44 }
 0x180   : > { %841 = vst [vmem:[%s1795_s26 + $0x158] sm:$0xff] %v2099_v51 }
 0x181   : > { %902 = vst [vmem:[%s1795_s26 + $0x340] sm:$0xff] %v2144_v28 }
 0x182   : > { %903 = vst [vmem:[%s1795_s26 + $0x348] sm:$0xff] %v2149_v31  ;;  %v601_v52 = vpop.f32.mrf.mxu2 }
 0x183   : > { %v770_v0 = vpop.f32.mrf.mxu3 }
 0x184   : > { %v524_v58 = vpop.f32.mrf.mxu0  ;;  %v2167_v10 = vadd.f32 %v770_v0, %v1791_v33 }
 0x185   : > { %v2116_v62 = vadd.f32 %v524_v58, %v1789_v32  ;;  %v693_v63 = vpop.f32.mrf.mxu1 }
 0x186   : > { %v2119_v2 = vadd.f32 %v693_v63, %v1791_v33  ;;  %v2162_v63 = vadd.f32 %v601_v52, %v1789_v32  ;;  %2470 = vst [vmem:[#allocation26_spill] sm:$0xff] %v2167_v10 }
 0x187   : > { %842 = vst [vmem:[%s1795_s26 + $0x160] sm:$0xff] %v2116_v62 }
 0x188   : > { %843 = vst [vmem:[%s1795_s26 + $0x168] sm:$0xff] %v2119_v2 }
 0x189   : > { %2469 = vst [vmem:[#allocation25_spill] sm:$0xff] %v2162_v63 }
 0x18a   : > { %904 = vst [vmem:[%s1795_s26 + $0x350] sm:$0xff] %v2162_v63  ;;  %v604_v25 = vpop.f32.mrf.mxu2 }
 0x18b   : > { %905 = vst [vmem:[%s1795_s26 + $0x358] sm:$0xff] %v2167_v10  ;;  %v2182_v52 = vadd.f32 %v604_v25, %v1789_v32 }
 0x18c   : > { %v526_v13 = vpop.f32.mrf.mxu0 }
 0x18d   : > { %v2136_v18 = vadd.f32 %v526_v13, %v1789_v32  ;;  %v695_v21 = vpop.f32.mrf.mxu1  ;;  %2471 = vst [vmem:[#allocation27_spill] sm:$0xff] %v2182_v52 }
 0x18e   : > { %v2139_v24 = vadd.f32 %v695_v21, %v1791_v33  ;;  %906 = vst [vmem:[%s1795_s26 + $0x360] sm:$0xff] %v2182_v52 }
 0x18f   : > { %844 = vst [vmem:[%s1795_s26 + $0x170] sm:$0xff] %v2136_v18 }
 0x190   : > { %845 = vst [vmem:[%s1795_s26 + $0x178] sm:$0xff] %v2139_v24 }
 0x192   : > { %v606_v63 = vpop.f32.mrf.mxu2 }
 0x193   : > { %v2195_v25 = vadd.f32 %v606_v63, %v1789_v32 }
 0x194   : > { %v529_v40 = vpop.f32.mrf.mxu0 }
 0x195   : > { %v2156_v48 = vadd.f32 %v529_v40, %v1789_v32  ;;  %v698_v50 = vpop.f32.mrf.mxu1  ;;  %2473 = vst [vmem:[#allocation29_spill] sm:$0xff] %v2195_v25 }
 0x196   : > { %v2159_v58 = vadd.f32 %v698_v50, %v1791_v33  ;;  %v773_v50 = vpop.f32.mrf.mxu3  ;;  %908 = vst [vmem:[%s1795_s26 + $0x370] sm:$0xff] %v2195_v25 }
 0x197   : > { %846 = vst [vmem:[%s1795_s26 + $0x180] sm:$0xff] %v2156_v48  ;;  %v2186_v0 = vadd.f32 %v773_v50, %v1791_v33 }
 0x198   : > { %847 = vst [vmem:[%s1795_s26 + $0x188] sm:$0xff] %v2159_v58 }
 0x199   : > { %2472 = vst [vmem:[#allocation28_spill] sm:$0xff] %v2186_v0 }
 0x19a   : > { %907 = vst [vmem:[%s1795_s26 + $0x368] sm:$0xff] %v2186_v0 }
 0x19c   : > { %v531_v13 = vpop.f32.mrf.mxu0 }
 0x19d   : > { %v2176_v21 = vadd.f32 %v531_v13, %v1789_v32  ;;  %v700_v22 = vpop.f32.mrf.mxu1 }
 0x19e   : > { %v701_v40 = vadd.f32 %v700_v22, %v1791_v33  ;;  %v775_v28 = vpop.f32.mrf.mxu3 }
 0x19f   : > { %848 = vst [vmem:[%s1795_s26 + $0x190] sm:$0xff] %v2176_v21  ;;  %v2199_v50 = vadd.f32 %v775_v28, %v1791_v33 }
 0x1a0   : > { %849 = vst [vmem:[%s1795_s26 + $0x198] sm:$0xff] %v701_v40 }
 0x1a1   : > { %2474 = vst [vmem:[#allocation30_spill] sm:$0xff] %v2199_v50 }
 0x1a2   : > { %909 = vst [vmem:[%s1795_s26 + $0x378] sm:$0xff] %v2199_v50 }
 0x1a4   : > { %v534_v13 = vpop.f32.mrf.mxu0 }
 0x1a5   : > { %v535_v22 = vadd.f32 %v534_v13, %v1789_v32  ;;  %v703_v10 = vpop.f32.mrf.mxu1 }
 0x1a6   : > { %v704_v31 = vadd.f32 %v703_v10, %v1791_v33  ;;  %v609_v10 = vpop.f32.mrf.mxu2  ;;  %v778_v12 = vpop.f32.mrf.mxu3 }
 0x1a7   : > { %850 = vst [vmem:[%s1795_s26 + $0x1a0] sm:$0xff] %v535_v22  ;;  %v2216_v53 = vadd.f32 %v778_v12, %v1791_v33  ;;  %v1009_v12 = vadd.f32 %v2089_v39, %v2099_v51 }
 0x1a8   : > { %851 = vst [vmem:[%s1795_s26 + $0x1a8] sm:$0xff] %v704_v31 }
 0x1a9   : > { %2476 = vst [vmem:[#allocation32_spill] sm:$0xff] %v2216_v53 }
 0x1aa   : > { %911 = vst [vmem:[%s1795_s26 + $0x388] sm:$0xff] %v2216_v53  ;;  %v1010_v53 = vadd.f32 %v1009_v12, %v2119_v2 }
 0x1ac   : > { %v536_v13 = vpop.f32.mrf.mxu0 }
 0x1ad   : > { %v537_v0 = vadd.f32 %v536_v13, %v1789_v32  ;;  %v705_v52 = vpop.f32.mrf.mxu1  ;;  %v2213_v13 = vadd.f32 %v609_v10, %v1789_v32 }
 0x1ae   : > { %v706_v63 = vadd.f32 %v705_v52, %v1791_v33  ;;  %v611_v50 = vpop.f32.mrf.mxu2  ;;  %v780_v52 = vpop.f32.mrf.mxu3 }
 0x1af   : > { %852 = vst [vmem:[%s1795_s26 + $0x1b0] sm:$0xff] %v537_v0  ;;  %v2220_v37 = vadd.f32 %v611_v50, %v1789_v32  ;;  %v2224_v30 = vadd.f32 %v780_v52, %v1791_v33 }
 0x1b0   : > { %853 = vst [vmem:[%s1795_s26 + $0x1b8] sm:$0xff] %v706_v63 }
 0x1b1   : > { %2475 = vst [vmem:[#allocation31_spill] sm:$0xff] %v2213_v13 }
 0x1b2   : > { %910 = vst [vmem:[%s1795_s26 + $0x380] sm:$0xff] %v2213_v13 }
 0x1b3   : > { %912 = vst [vmem:[%s1795_s26 + $0x390] sm:$0xff] %v2220_v37 }
 0x1b4   : > { %v539_v28 = vpop.f32.mrf.mxu0  ;;  %913 = vst [vmem:[%s1795_s26 + $0x398] sm:$0xff] %v2224_v30 }
 0x1b5   : > { %v540_v25 = vadd.f32 %v539_v28, %v1789_v32  ;;  %v708_v8 = vpop.f32.mrf.mxu1 }
 0x1b6   : > { %v709_v56 = vadd.f32 %v708_v8, %v1791_v33  ;;  %v946_v8 = vadd.f32 %v2083_v36, %v2096_v44  ;;  %v614_v13 = vpop.f32.mrf.mxu2  ;;  %v783_v15 = vpop.f32.mrf.mxu3  ;;  %v1011_v44 = vadd.f32 %v1010_v53, %v2139_v24 }
 0x1b7   : > { %854 = vst [vmem:[%s1795_s26 + $0x1c0] sm:$0xff] %v540_v25  ;;  %v2252_v24 = vadd.f32 %v614_v13, %v1789_v32 }
 0x1b8   : > { %855 = vst [vmem:[%s1795_s26 + $0x1c8] sm:$0xff] %v709_v56  ;;  %v947_v10 = vadd.f32 %v946_v8, %v2116_v62  ;;  %v1012_v51 = vadd.f32 %v1011_v44, %v2159_v58 }
 0x1b9   : > { %914 = vst [vmem:[%s1795_s26 + $0x3a0] sm:$0xff] %v2252_v24 }
 0x1ba   : > { %v948_v36 = vadd.f32 %v947_v10, %v2136_v18  ;;  %v1013_v8 = vadd.f32 %v1012_v51, %v701_v40 }
 0x1bc   : > { %v541_v50 = vpop.f32.mrf.mxu0  ;;  %v949_v39 = vadd.f32 %v948_v36, %v2156_v48  ;;  %v1014_v10 = vadd.f32 %v1013_v8, %v704_v31  ;;  %v2255_v48 = vadd.f32 %v783_v15, %v1791_v33 }
 0x1bd   : > { %v542_v28 = vadd.f32 %v541_v50, %v1789_v32  ;;  %v710_v52 = vpop.f32.mrf.mxu1 }
 0x1be   : > { %v711_v19 = vadd.f32 %v710_v52, %v1791_v33  ;;  %v950_v62 = vadd.f32 %v949_v39, %v2176_v21  ;;  %v616_v18 = vpop.f32.mrf.mxu2  ;;  %v785_v58 = vpop.f32.mrf.mxu3  ;;  %915 = vst [vmem:[%s1795_s26 + $0x3a8] sm:$0xff] %v2255_v48 }
 0x1bf   : > { %856 = vst [vmem:[%s1795_s26 + $0x1d0] sm:$0xff] %v542_v28  ;;  %v2259_v40 = vadd.f32 %v616_v18, %v1789_v32  ;;  %v2263_v31 = vadd.f32 %v785_v58, %v1791_v33 }
 0x1c0   : > { %857 = vst [vmem:[%s1795_s26 + $0x1d8] sm:$0xff] %v711_v19  ;;  %v951_v2 = vadd.f32 %v950_v62, %v535_v22  ;;  %v1015_v22 = vadd.f32 %v1014_v10, %v706_v63 }
 0x1c1   : > { %916 = vst [vmem:[%s1795_s26 + $0x3b0] sm:$0xff] %v2259_v40 }
 0x1c2   : > { %v952_v21 = vadd.f32 %v951_v2, %v537_v0  ;;  %v1016_v13 = vadd.f32 %v1015_v22, %v709_v56  ;;  %917 = vst [vmem:[%s1795_s26 + $0x3b8] sm:$0xff] %v2263_v31 }
 0x1c4   : > { %v544_v50 = vpop.f32.mrf.mxu0  ;;  %v953_v36 = vadd.f32 %v952_v21, %v540_v25  ;;  %v1017_v0 = vadd.f32 %v1016_v13, %v711_v19 }
 0x1c5   : > { %v545_v12 = vadd.f32 %v544_v50, %v1789_v32  ;;  %v713_v52 = vpop.f32.mrf.mxu1 }
 0x1c6   : > { %v714_v53 = vadd.f32 %v713_v52, %v1791_v33  ;;  %v954_v15 = vadd.f32 %v953_v36, %v542_v28  ;;  %v619_v62 = vpop.f32.mrf.mxu2  ;;  %v788_v50 = vpop.f32.mrf.mxu3 }
 0x1c7   : > { %858 = vst [vmem:[%s1795_s26 + $0x1e0] sm:$0xff] %v545_v12  ;;  %v2284_v58 = vadd.f32 %v619_v62, %v1789_v32  ;;  %v2287_v21 = vadd.f32 %v788_v50, %v1791_v33 }
 0x1c8   : > { %859 = vst [vmem:[%s1795_s26 + $0x1e8] sm:$0xff] %v714_v53  ;;  %v955_v63 = vadd.f32 %v954_v15, %v545_v12  ;;  %v1018_v25 = vadd.f32 %v1017_v0, %v714_v53 }
 0x1c9   : > { %918 = vst [vmem:[%s1795_s26 + $0x3c0] sm:$0xff] %v2284_v58 }
 0x1ca   : > { %919 = vst [vmem:[%s1795_s26 + $0x3c8] sm:$0xff] %v2287_v21 }
 0x1cc   : > { %v546_v44 = vpop.f32.mrf.mxu0 }
 0x1cd   : > { %v547_v39 = vadd.f32 %v546_v44, %v1789_v32  ;;  %v715_v51 = vpop.f32.mrf.mxu1 }
 0x1ce   : > { %v716_v8 = vadd.f32 %v715_v51, %v1791_v33  ;;  %v621_v10 = vpop.f32.mrf.mxu2 }
 0x1cf   : > { %860 = vst [vmem:[%s1795_s26 + $0x1f0] sm:$0xff] %v547_v39  ;;  %v956_v56 = vadd.f32 %v955_v63, %v547_v39 }
 0x1d0   : > { %861 = vst [vmem:[%s1795_s26 + $0x1f8] sm:$0xff] %v716_v8  ;;  %v1019_v28 = vadd.f32 %v1018_v25, %v716_v8 }
 0x1d1   : > { %v957_v2 = vadd.f32 %v956_v56, %v1817_v3  ;;  %v2290_v3 = vadd.f32 %v621_v10, %v1789_v32 }
 0x1d2   : > { %v1020_v19 = vadd.f32 %v1019_v28, %v1823_v7  ;;  %v790_v7 = vpop.f32.mrf.mxu3 }
 0x1d3   : > { %v958_v12 = vadd.f32 %v957_v2, %v1832_v14  ;;  %920 = vst [vmem:[%s1795_s26 + $0x3d0] sm:$0xff] %v2290_v3 }
 0x1d4   : > { %v1021_v52 = vadd.f32 %v1020_v19, %v1836_v17  ;;  %v2294_v17 = vadd.f32 %v790_v7, %v1791_v33 }
 0x1d5   : > { %v959_v18 = vadd.f32 %v958_v12, %v1849_v29 }
 0x1d6   : > { %v1022_v53 = vadd.f32 %v1021_v52, %v1855_v35  ;;  %921 = vst [vmem:[%s1795_s26 + $0x3d8] sm:$0xff] %v2294_v17 }
 0x1d7   : > { %v960_v14 = vadd.f32 %v959_v18, %v1864_v42 }
 0x1d8   : > { %v1023_v29 = vadd.f32 %v1022_v53, %v1868_v45  ;;  %v624_v45 = vpop.f32.mrf.mxu2 }
 0x1d9   : > { %v961_v35 = vadd.f32 %v960_v14, %v1881_v57 }
 0x1da   : > { %v1024_v22 = vadd.f32 %v1023_v29, %v1887_v61  ;;  %v793_v0 = vpop.f32.mrf.mxu3 }
 0x1db   : > { %v962_v36 = vadd.f32 %v961_v35, %v1896_v5 }
 0x1dc   : > { %v1025_v42 = vadd.f32 %v1024_v22, %v1900_v9 }
 0x1dd   : > { %v963_v13 = vadd.f32 %v962_v36, %v1913_v23 }
 0x1de   : > { %v1026_v15 = vadd.f32 %v1025_v42, %v1919_v27 }
 0x1df   : > { %v964_v57 = vadd.f32 %v963_v13, %v1928_v38 }
 0x1e0   : > { %v1027_v61 = vadd.f32 %v1026_v15, %v1932_v41  ;;  %v626_v38 = vpop.f32.mrf.mxu2 }
 0x1e1   : > { %v965_v44 = vadd.f32 %v964_v57, %v1945_v55  ;;  %v2325_v55 = vadd.f32 %v624_v45, %v1789_v32 }
 0x1e2   : > { %v1028_v5 = vadd.f32 %v1027_v61, %v1951_v60  ;;  %v2328_v60 = vadd.f32 %v793_v0, %v1791_v33 }
 0x1e3   : > { %v966_v9 = vadd.f32 %v965_v44, %v1960_v6  ;;  %v2331_v6 = vadd.f32 %v626_v38, %v1789_v32  ;;  %922 = vst [vmem:[%s1795_s26 + $0x3e0] sm:$0xff] %v2325_v55 }
 0x1e4   : > { %v1029_v23 = vadd.f32 %v1028_v5, %v1964_v11  ;;  %v795_v11 = vpop.f32.mrf.mxu3  ;;  %923 = vst [vmem:[%s1795_s26 + $0x3e8] sm:$0xff] %v2328_v60 }
 0x1e5   : > { %v967_v27 = vadd.f32 %v966_v9, %v1977_v26  ;;  %v2335_v63 = vadd.f32 %v795_v11, %v1791_v33  ;;  %924 = vst [vmem:[%s1795_s26 + $0x3f0] sm:$0xff] %v2331_v6 }
 0x1e6   : > { %v1030_v41 = vadd.f32 %v1029_v23, %v1983_v34 }
 0x1e7   : > { %v968_v26 = vadd.f32 %v967_v27, %v1992_v46  ;;  %925 = vst [vmem:[%s1795_s26 + $0x3f8] sm:$0xff] %v2335_v63 }
 0x1e8   : > { %v1031_v39 = vadd.f32 %v1030_v41, %v1996_v49 }
 0x1e9   : > { %v969_v34 = vadd.f32 %v968_v26, %v2009_v1 }
 0x1ea   : > { %v1032_v32 = vadd.f32 %v1031_v39, %v2013_v4 }
 0x1eb   : > { %v970_v46 = vadd.f32 %v969_v34, %v2022_v16 }
 0x1ec   : > { %v1033_v33 = vadd.f32 %v1032_v32, %v2026_v20 }
 0x1ed   : > { %1532 = shalt.err (!%p1529_p10)
}
 0x1ee   : > { %s1613_s21 = smov 256   ;;  %s1614_s26 = smov 16   ;;  %v971_v49 = vadd.f32 %v970_v46, %v2039_v43  ;;  %v1034_v1 = vadd.f32 %v1033_v33, %v2043_v47  ;;  %v2477_v20 = vld [vmem:[#allocation15_spill] sm:$0xff]  ;;  %v2478_v62 = vld [vmem:[#allocation16_spill] sm:$0xff]  ;;  %v2479_v8 = vld [vmem:[#allocation17_spill] sm:$0xff] }
 0x1ef   : > { %1349 = dma.vmem_to_hbm [thread:$0]  (%p1709_p3), %s1074_s8, 16384, %s1076_s9, %s1055_s24, %s1613_s21, %s1613_s21, %s1614_s26   ;;  %v2480_v56 = vld [vmem:[#allocation18_spill] sm:$0xff]  ;;  %v2481_v2 = vld [vmem:[#allocation19_spill] sm:$0xff]  ;;  %v2482_v12 = vld [vmem:[#allocation20_spill] sm:$0xff] }
 0x1f0   : > { %v972_v4 = vadd.f32 %v971_v49, %v2052_v54  ;;  %v1035_v16 = vadd.f32 %v1034_v1, %v2056_v59  ;;  %v2483_v18 = vld [vmem:[#allocation21_spill] sm:$0xff]  ;;  %v2484_v10 = vld [vmem:[#allocation22_spill] sm:$0xff]  ;;  %v2485_v53 = vld [vmem:[#allocation23_spill] sm:$0xff]  ;;  %s1229_s6 = sshll.u32 %s1742_s20, 4  ;;  %s1322_s7 = sshll.u32 %s1661_s19, 4 }
 0x1f1   : > { %v2486_v59 = vld [vmem:[#allocation24_spill] sm:$0xff]  ;;  %v2487_v14 = vld [vmem:[#allocation25_spill] sm:$0xff]  ;;  %v2488_v35 = vld [vmem:[#allocation26_spill] sm:$0xff]  ;;  %s1089_s8 = scalar_lea.hbm %s2435_s4, %s1322_s7  ;;  %s259_s9 = scalar_lea.vmem [#allocation9], %s1229_s6 }
 0x1f2   : > { %v973_v51 = vadd.f32 %v972_v4, %v2477_v20  ;;  %v1036_v25 = vadd.f32 %v1035_v16, %v2478_v62  ;;  %v2489_v36 = vld [vmem:[#allocation27_spill] sm:$0xff]  ;;  %v2490_v13 = vld [vmem:[#allocation28_spill] sm:$0xff]  ;;  %v2491_v15 = vld [vmem:[#allocation29_spill] sm:$0xff]  ;;  %s1091_s19 = sshll.u32 %s259_s9, 4  ;;  %s1093_s24 = sshll.u32 %s1089_s8, 4  ;;  %s1092_s19 = int_to_ptr.vmem [resolvable:$true] %s1091_s19  ;;  %s1094_s24 = int_to_ptr.hbm [resolvable:$true] %s1093_s24 }
 0x1f3   : > { %v2492_v57 = vld [vmem:[#allocation30_spill] sm:$0xff]  ;;  %v2493_v44 = vld [vmem:[#allocation31_spill] sm:$0xff]  ;;  %v2494_v9 = vld [vmem:[#allocation32_spill] sm:$0xff]  ;;  %s1060_s23 = scalar_lea.sflag [#allocation10], %s1742_s20  ;;  %s1547_s25 = sshra.s32 %s1094_s24, 4  ;;  %s1548_s25 = int_to_ptr.hbm [resolvable:$true] %s1547_s25 }
 0x1f4   : > { %v974_v50 = vadd.f32 %v973_v51, %v2479_v8  ;;  %v1037_v28 = vadd.f32 %v1036_v25, %v2480_v56  ;;  %s1549_s27 = scalar_lea.hbm %s1548_s25, 16  ;;  %s1553_s11 = scalar_lea.hbm %s2435_s4, 32 }
 0x1f5   : > { %p1550_p12 = scmp.ne.s32.totalorder %s1548_s25, %s1549_s27  ;;  %p1554_p5 = scmp.lt.s32.totalorder %s1548_s25, %s2435_s4 }
 0x1f6   : > { %v975_v19 = vadd.f32 %v974_v50, %v2481_v2  ;;  %v1038_v52 = vadd.f32 %v1037_v28, %v2482_v12  ;;  %p1555_p7 = scmp.lt.s32.totalorder %s1553_s11, %s1549_s27 }
 0x1f7   : > { %p1551_p13 = pnand %p1550_p12, %p1709_p3 }
 0x1f8   : > { %v976_v43 = vadd.f32 %v975_v19, %v2483_v18  ;;  %v1039_v47 = vadd.f32 %v1038_v52, %v2484_v10  ;;  %p1556_p1 = por %p1555_p7, %p1554_p5 }
 0x1f9   : > { %p1552_p0 = pneg %p1551_p13 }
 0x1fa   : > { %v977_v54 = vadd.f32 %v976_v43, %v2485_v53  ;;  %v1040_v7 = vadd.f32 %v1039_v47, %v2486_v59 }
 0x1fb   : > { %p1557_p4 = pnand %p1556_p1, %p1552_p0 }
 0x1fc   : > { %v978_v29 = vadd.f32 %v977_v54, %v2487_v14  ;;  %v1041_v22 = vadd.f32 %v1040_v7, %v2488_v35 }
 0x1fe   : > { %v979_v42 = vadd.f32 %v978_v29, %v2489_v36  ;;  %v1042_v45 = vadd.f32 %v1041_v22, %v2490_v13 }
 0x200   : > { %v980_v0 = vadd.f32 %v979_v42, %v2491_v15  ;;  %v1043_v61 = vadd.f32 %v1042_v45, %v2492_v57 }
 0x202   : > { %v981_v5 = vadd.f32 %v980_v0, %v2493_v44  ;;  %v1044_v23 = vadd.f32 %v1043_v61, %v2494_v9 }
 0x204   : > { %v982_v27 = vadd.f32 %v981_v5, %v2220_v37  ;;  %v1045_v38 = vadd.f32 %v1044_v23, %v2224_v30 }
 0x206   : > { %v983_v41 = vadd.f32 %v982_v27, %v2252_v24  ;;  %v1046_v11 = vadd.f32 %v1045_v38, %v2255_v48 }
 0x208   : > { %v984_v26 = vadd.f32 %v983_v41, %v2259_v40  ;;  %v1047_v39 = vadd.f32 %v1046_v11, %v2263_v31 }
 0x20a   : > { %v985_v34 = vadd.f32 %v984_v26, %v2284_v58  ;;  %v1048_v32 = vadd.f32 %v1047_v39, %v2287_v21 }
 0x20c   : > { %v986_v30 = vadd.f32 %v985_v34, %v2290_v3  ;;  %v1049_v37 = vadd.f32 %v1048_v32, %v2294_v17 }
 0x20e   : > { %v987_v24 = vadd.f32 %v986_v30, %v2325_v55  ;;  %v1050_v48 = vadd.f32 %v1049_v37, %v2328_v60 }
 0x210   : > { %v988_v40 = vadd.f32 %v987_v24, %v2331_v6  ;;  %v1051_v31 = vadd.f32 %v1050_v48, %v2335_v63 }
 0x212   : > { %1052 = vst [vmem:[%s259_s9] sm:$0xff] %v988_v40 }
 0x213   : > { %1053 = vst [vmem:[%s259_s9 + $0x8] sm:$0xff] %v1051_v31 }
 0x214   : > { %1560 = shalt.err (!%p1557_p4)
}
 0x215   : > { %1350 = dma.vmem_to_hbm [thread:$0]  (%p1709_p3), %s1092_s19, 256, %s1094_s24, %s1060_s23  }
 0x216 PF: > { %s1105_s20 = sand.u32 1, %s1595_s15   ;;  %p2495_p8 = scmp.ge.s32.totalorder %s1607_s18, 2 }
 0x217   : > { %s1106_s26 = scalar_lea.sflag [#allocation4], %s1105_s20 }
 0x218   : > { %p1365_p11 = pnand %p2495_p8, %p1675_p6 }
 0x21a   : > { %p1366_p2 = pneg %p1365_p11 }
 0x21c   : > { %1586 = dma.done.wait (%p1366_p2), %s1106_s26, 16384  }
 0x21d   : > { %1588 = vsyncadd (%p1366_p2), %s1106_s26, 4294950912  ;;  %s1116_s6 = scalar_lea.sflag [#allocation10], %s1105_s20 }
 0x21e   : > { %1590 = dma.done.wait (%p1366_p2), %s1116_s6, 256  }
 0x21f   : > { %1592 = vsyncadd (%p1366_p2), %s1116_s6, 4294967040  ;;  %p22_p3 = scmp.ge.s32.totalorder %s1699_s10, 4   ;;  %s2496_s15 = smov %s1599_s16 }
 0x220   : > { %s2497_s16 = smov %s1603_s17  ;;  %s2498_s17 = smov %s1715_s14 }
 0x221   : > { %s2499_s18 = smov %s1699_s10  ;;  %24 = sbr.rel (!%p22_p3) target bundleno = 8 (0x8), region = 102 }
 0x226   :  { %1122 = vsyncpa [#allocation3], 1 }
 0x227   :  { %1124 = vsyncpa [#allocation3 + $0x1], 1 }
 0x228   :  { %1125 = vsyncpa [#allocation6], 1 }
 0x229   :  { %1126 = vsyncpa [#allocation4], 1 }
 0x22a   :  { %1128 = vsyncpa [#allocation4 + $0x1], 1 }
 0x22b   :  { %1129 = vsyncpa [#allocation10], 1 }
 0x22c   :  { %1131 = vsyncpa [#allocation10 + $0x1], 1 }

</bundles_post_ra>
